<compile_context>
chip_gen: v7x
topology: tpu7x:2x2x1
jax: 0.10.0
libtpu: 0.0.40
codegen_flags: <defaults>
</compile_context>

<pallas_src>
import jax
import jax.numpy as jnp
from jax.experimental import pallas as pl
from jax.experimental.pallas import tpu as pltpu

# ----------------------------------------------------------------------------
# Model / layout constants
# ----------------------------------------------------------------------------
BATCH   = 2
IN_CH   = 3            # input_dim
CIN_PAD = 8            # input channels padded to a sublane multiple
H_DIM   = 8            # h_dim
Z_DIM   = 2            # z_dim
OUT_CH  = 3            # output_channels
OUT_PAD = 8            # deconv2 output channels padded for aligned stores
IM      = 16           # input spatial size (reference uses 256)
FEAT_SP = IM // 4      # spatial size after two stride-2 convs (reference: 64)
FLAT    = 2 * H_DIM * FEAT_SP * FEAT_SP

# Encoder plane geometry: conv1's output is produced directly as mod-2 phase planes of
# its padded output (plane extent ENC_P) so conv2's taps are unit shifts.
ENC_P      = IM // 4 + 2            # 6
ENC_PP     = ENC_P * ENC_P          # 36 plane positions per batch element
ENC_MARGIN = 8                      # >= ENC_P + 1 : room for flat unit shifts
ENC_PPM    = ENC_PP + ENC_MARGIN    # 44

# Decoder plane geometry: fc_dec output / deconv phases live on a FEAT_SP grid with one
# zero pad row/col (the sub-pixel deconv's bottom/right padding).
DEC_P      = FEAT_SP + 1            # 5
DEC_PP     = DEC_P * DEC_P          # 25
DEC_MARGIN = 8                      # >= DEC_P + 1
DEC_PPM    = DEC_PP + DEC_MARGIN    # 33

MXU_DTYPE = jnp.bfloat16            # conv/deconv matmul input dtype (f32 accumulation)


# ----------------------------------------------------------------------------
# Pallas kernels
# ----------------------------------------------------------------------------
def _encoder_kernel(x4_ref, mask_ref, w1_ref, b1_ref, w2_ref, b2_ref, h2_ref):
    """conv1(s=2,p=1)+relu + conv2(s=2,p=1)+relu for one batch element, fully in VMEM.

    x4_ref holds the mod-4 phase planes of the zero-padded input image (flattened), so
    every stride-2 tap is a static lane-offset slice; each conv is a single bf16 MXU
    matmul (K = 9 taps * channels) with f32 accumulation.
    """
    planes = [x4_ref[i] for i in range(16)]                  # (CIN_PAD, ENC_PPM) each

    # ---- conv1: emit the 4 mod-2 phase planes of its *padded* output ----------------
    y1 = {}
    for pvh in range(2):
        for pvw in range(2):
            taps = []
            for kh in range(3):
                for kw in range(3):
                    th, tw = 2 * pvh + kh, 2 * pvw + kw      # padded-input phase coords
                    src = planes[4 * (th % 4) + (tw % 4)]
                    s = (th // 4) * ENC_P + (tw // 4)        # flat unit shift
                    taps.append(src[:, s:s + ENC_PP])
            cat = jnp.concatenate(taps, axis=0)              # (9*CIN_PAD, ENC_PP) bf16
            acc = jnp.dot(w1_ref[...], cat, preferred_element_type=jnp.float32)
            acc = jnp.maximum(acc + b1_ref[...], 0.0)
            idx = 2 * pvh + pvw
            acc = acc * mask_ref[idx:idx + 1, :]             # zero conv2's pad ring / junk
            y1[(pvh, pvw)] = jnp.concatenate(
                [acc.astype(MXU_DTYPE),
                 jnp.zeros((H_DIM, ENC_MARGIN), MXU_DTYPE)], axis=1)

    # ---- conv2 (reads conv1's phase planes with unit shifts) -------------------------
    taps2 = []
    for kh in range(3):
        for kw in range(3):
            src = y1[(kh % 2, kw % 2)]
            s = (kh // 2) * ENC_P + (kw // 2)
            taps2.append(src[:, s:s + ENC_PP])
    cat2 = jnp.concatenate(taps2, axis=0)                    # (9*H_DIM, ENC_PP) bf16
    acc2 = jnp.dot(w2_ref[...], cat2, preferred_element_type=jnp.float32)
    h2_ref[...] = jnp.maximum(acc2 + b2_ref[...], 0.0)


def _fc_head_kernel(h_ref, we_ref, be_ref, wm_ref, bm_ref, wl_ref, bl_ref,
                    eps_ref, wd_ref, bd_ref, d_ref, mu_ref, lv_ref):
    """fc_enc -> relu -> fc_mu / fc_logvar -> reparameterize -> fc_dec -> relu (f32)."""
    e = jnp.dot(h_ref[...], we_ref[...], preferred_element_type=jnp.float32) + be_ref[...]
    e = jnp.maximum(e, 0.0)
    mu = jnp.dot(e, wm_ref[...], preferred_element_type=jnp.float32) + bm_ref[...]
    lv = jnp.dot(e, wl_ref[...], preferred_element_type=jnp.float32) + bl_ref[...]
    z = mu + eps_ref[...] * jnp.exp(0.5 * lv)
    d = jnp.dot(z, wd_ref[...], preferred_element_type=jnp.float32) + bd_ref[...]
    d_ref[...] = jnp.maximum(d, 0.0)
    mu_ref[...] = mu
    lv_ref[...] = lv


def _decoder_kernel(d_ref, mask_ref, w1_ref, b1_ref, w2_ref, b2_ref, o_ref):
    """deconv1(sub-pixel)+relu + deconv2(sub-pixel)+sigmoid for one batch element.

    deconv1's full-resolution output is never materialised: it stays as 4 sub-pixel
    phase planes in VMEM and deconv2 reads them phase-composed, so there is no
    depth-to-space relayout between the two layers.
    """
    d = d_ref[...]                                           # (2*H_DIM, DEC_PPM) bf16

    # ---- deconv1: all 4 sub-pixel output phases from ONE matmul ----------------------
    taps = []
    for dh in range(2):
        for dw in range(2):
            s = dh * DEC_P + dw
            taps.append(d[:, s:s + DEC_PP])
    cat = jnp.concatenate(taps, axis=0)                      # (4*2*H_DIM, DEC_PP) bf16
    y = jnp.dot(w1_ref[...], cat, preferred_element_type=jnp.float32)   # (4*H_DIM, PP)
    y = jnp.maximum(y + b1_ref[...], 0.0) * mask_ref[...]    # junk border -> deconv2 pad
    ybf = y.astype(MXU_DTYPE)
    phases = {}
    for rh in range(2):
        for rw in range(2):
            blk = ybf[(2 * rh + rw) * H_DIM:(2 * rh + rw + 1) * H_DIM, :]
            phases[(rh, rw)] = jnp.concatenate(
                [blk, jnp.zeros((H_DIM, DEC_MARGIN), MXU_DTYPE)], axis=1)

    # ---- deconv2, phase-composed: one matmul per input-grid parity -------------------
    for pm in range(2):
        for pn in range(2):
            taps2 = []
            for dh in range(2):
                for dw in range(2):
                    th, tw = pm + dh, pn + dw
                    src = phases[(th % 2, tw % 2)]
                    s = (th // 2) * DEC_P + (tw // 2)
                    taps2.append(src[:, s:s + DEC_PP])
            cat2 = jnp.concatenate(taps2, axis=0)            # (4*H_DIM, DEC_PP) bf16
            acc = jnp.dot(w2_ref[...], cat2, preferred_element_type=jnp.float32)
            acc = acc + b2_ref[...]
            sig = 1.0 / (1.0 + jnp.exp(-acc))                # exact sigmoid, f32 epilogue
            for rh in range(2):
                for rw in range(2):
                    blk = sig[(2 * rh + rw) * OUT_PAD:(2 * rh + rw + 1) * OUT_PAD, :]
                    o_ref[4 * (2 * pm + rh) + (2 * pn + rw)] = blk


# ----------------------------------------------------------------------------
# pallas_call wrappers
# ----------------------------------------------------------------------------
def encoder_forward(x4, p):
    B = x4.shape[0]
    return pl.pallas_call(
        _encoder_kernel,
        out_shape=jax.ShapeDtypeStruct((B, 2 * H_DIM, ENC_PP), jnp.float32),
        grid=(B,),
        in_specs=[
            pl.BlockSpec((None, 16, CIN_PAD, ENC_PPM), lambda b: (b, 0, 0, 0)),
            pl.BlockSpec((4, ENC_PP), lambda b: (0, 0)),
            pl.BlockSpec((H_DIM, 9 * CIN_PAD), lambda b: (0, 0)),
            pl.BlockSpec((H_DIM, 1), lambda b: (0, 0)),
            pl.BlockSpec((2 * H_DIM, 9 * H_DIM), lambda b: (0, 0)),
            pl.BlockSpec((2 * H_DIM, 1), lambda b: (0, 0)),
        ],
        out_specs=pl.BlockSpec((None, 2 * H_DIM, ENC_PP), lambda b: (b, 0, 0)),
        compiler_params=pltpu.CompilerParams(dimension_semantics=("parallel",)),
    )(x4, p["enc_mask"], p["conv1_w"], p["conv1_b"], p["conv2_w"], p["conv2_b"])


def fc_head(h_flat, eps, p):
    B = h_flat.shape[0]
    args = [h_flat,
            p["fc_enc_w"], p["fc_enc_b"],
            p["fc_mu_w"], p["fc_mu_b"],
            p["fc_lv_w"], p["fc_lv_b"],
            eps,
            p["fc_dec_w"], p["fc_dec_b"]]
    d_dim = p["fc_dec_w"].shape[1]
    z_dim = p["fc_mu_w"].shape[1]
    return pl.pallas_call(
        _fc_head_kernel,
        out_shape=(jax.ShapeDtypeStruct((B, d_dim), jnp.float32),
                   jax.ShapeDtypeStruct((B, z_dim), jnp.float32),
                   jax.ShapeDtypeStruct((B, z_dim), jnp.float32)),
        grid=(1,),
        in_specs=[pl.BlockSpec(a.shape, lambda i: (0, 0)) for a in args],
        out_specs=(pl.BlockSpec((B, d_dim), lambda i: (0, 0)),
                   pl.BlockSpec((B, z_dim), lambda i: (0, 0)),
                   pl.BlockSpec((B, z_dim), lambda i: (0, 0))),
        compiler_params=pltpu.CompilerParams(dimension_semantics=("arbitrary",)),
    )(*args)


def decoder_forward(d, p):
    B = d.shape[0]
    return pl.pallas_call(
        _decoder_kernel,
        out_shape=jax.ShapeDtypeStruct((B, 16, OUT_PAD, DEC_PP), jnp.float32),
        grid=(B,),
        in_specs=[
            pl.BlockSpec((None, 2 * H_DIM, DEC_PPM), lambda b: (b, 0, 0)),
            pl.BlockSpec((1, DEC_PP), lambda b: (0, 0)),
            pl.BlockSpec((4 * H_DIM, 4 * 2 * H_DIM), lambda b: (0, 0)),
            pl.BlockSpec((4 * H_DIM, 1), lambda b: (0, 0)),
            pl.BlockSpec((4 * OUT_PAD, 4 * H_DIM), lambda b: (0, 0)),
            pl.BlockSpec((4 * OUT_PAD, 1), lambda b: (0, 0)),
        ],
        out_specs=pl.BlockSpec((None, 16, OUT_PAD, DEC_PP), lambda b: (b, 0, 0, 0)),
        compiler_params=pltpu.CompilerParams(dimension_semantics=("parallel",)),
    )(d, p["dec_mask"], p["deconv1_w"], p["deconv1_b"], p["deconv2_w"], p["deconv2_b"])


# ----------------------------------------------------------------------------
# Parameter / mask preparation (all layout work done once at init)
# ----------------------------------------------------------------------------
def _conv_tap_matrix(w, cin_pad):
    """Conv2d weight (Cout,Cin,3,3) -> (Cout, 9*cin_pad); columns ordered
    ((kh,kw) major, channel minor), channels zero-padded to cin_pad."""
    cout, cin, k, _ = w.shape
    m = jnp.zeros((cout, k * k, cin_pad), jnp.float32)
    m = m.at[:, :, :cin].set(w.transpose(0, 2, 3, 1).reshape(cout, k * k, cin))
    return m.reshape(cout, k * k * cin_pad)


def _subpixel_matrix(w, cout_pad=None):
    """ConvTranspose2d weight (Cin,Cout,3,3), stride=2, padding=1, output_padding=1 ->
    sub-pixel matrix (4*cout_pad, 4*Cin); rows ordered (rh,rw,co), columns (dh,dw,ci).
    Output pixel (2m+rh, 2n+rw) = sum_{dh,dw in {0,1}} x[m+dh,n+dw] * w[:,:,rh+1-2dh,rw+1-2dw]."""
    cin, cout, k, _ = w.shape
    cp = cout if cout_pad is None else cout_pad
    wm = jnp.zeros((2, 2, cp, 2, 2, cin), jnp.float32)
    for rh in range(2):
        for rw in range(2):
            for dh in range(2):
                for dw in range(2):
                    kh, kw = rh + 1 - 2 * dh, rw + 1 - 2 * dw
                    if 0 <= kh < k and 0 <= kw < k:
                        wm = wm.at[rh, rw, :cout, dh, dw, :].set(w[:, :, kh, kw].T)
    return wm.reshape(4 * cp, 4 * cin)


def _enc_masks():
    """Validity masks (4, ENC_PP) for conv1's 4 output phase planes: 1 where the plane
    position is a real conv1 output, 0 where it is conv2's padding ring / junk."""
    idx = jnp.arange(ENC_P)
    per = []
    for pv in (0, 1):
        v = 2 * idx + pv - 1
        per.append(((v >= 0) & (v < IM // 2)).astype(jnp.float32))
    rows = []
    for pvh in (0, 1):
        for pvw in (0, 1):
            rows.append((per[pvh][:, None] * per[pvw][None, :]).reshape(-1))
    return jnp.stack(rows, 0)


def _dec_mask():
    v = (jnp.arange(DEC_P) < FEAT_SP).astype(jnp.float32)
    return (v[:, None] * v[None, :]).reshape(1, -1)


def _uniform(key, shape, fan_in):
    bound = 1.0 / (fan_in ** 0.5)
    return jax.random.uniform(key, shape, jnp.float32, -bound, bound)


def init_params(key):
    ks = jax.random.split(key, 16)
    # Raw weights in PyTorch layouts (also used by the pure-JAX reference check).
    raw = {
        "conv1_w": _uniform(ks[0], (H_DIM, IN_CH, 3, 3), IN_CH * 9),
        "conv1_b": _uniform(ks[1], (H_DIM,), IN_CH * 9),
        "conv2_w": _uniform(ks[2], (2 * H_DIM, H_DIM, 3, 3), H_DIM * 9),
        "conv2_b": _uniform(ks[3], (2 * H_DIM,), H_DIM * 9),
        "fc_enc_w": _uniform(ks[4], (2 * Z_DIM, FLAT), FLAT),
        "fc_enc_b": _uniform(ks[5], (2 * Z_DIM,), FLAT),
        "fc_mu_w": _uniform(ks[6], (Z_DIM, 2 * Z_DIM), 2 * Z_DIM),
        "fc_mu_b": _uniform(ks[7], (Z_DIM,), 2 * Z_DIM),
        "fc_logvar_w": _uniform(ks[8], (Z_DIM, 2 * Z_DIM), 2 * Z_DIM),
        "fc_logvar_b": _uniform(ks[9], (Z_DIM,), 2 * Z_DIM),
        "fc_dec_w": _uniform(ks[10], (FLAT, Z_DIM), Z_DIM),
        "fc_dec_b": _uniform(ks[11], (FLAT,), Z_DIM),
        "deconv1_w": _uniform(ks[12], (2 * H_DIM, H_DIM, 3, 3), 2 * H_DIM * 9),
        "deconv1_b": _uniform(ks[13], (H_DIM,), 2 * H_DIM * 9),
        "deconv2_w": _uniform(ks[14], (H_DIM, OUT_CH, 3, 3), H_DIM * 9),
        "deconv2_b": _uniform(ks[15], (OUT_CH,), H_DIM * 9),
    }
    b2p = jnp.concatenate([raw["deconv2_b"], jnp.zeros((OUT_PAD - OUT_CH,), jnp.float32)])
    # Kernel-ready layouts: pre-transposed / pre-padded; conv/deconv weights in bf16.
    p = {
        "conv1_w": _conv_tap_matrix(raw["conv1_w"], CIN_PAD).astype(MXU_DTYPE),
        "conv1_b": raw["conv1_b"].reshape(-1, 1),
        "conv2_w": _conv_tap_matrix(raw["conv2_w"], H_DIM).astype(MXU_DTYPE),
        "conv2_b": raw["conv2_b"].reshape(-1, 1),
        "fc_enc_w": raw["fc_enc_w"].T,                 # (FLAT, 2Z)
        "fc_enc_b": raw["fc_enc_b"].reshape(1, -1),
        "fc_mu_w": raw["fc_mu_w"].T,                   # (2Z, Z)
        "fc_mu_b": raw["fc_mu_b"].reshape(1, -1),
        "fc_lv_w": raw["fc_logvar_w"].T,               # (2Z, Z)
        "fc_lv_b": raw["fc_logvar_b"].reshape(1, -1),
        "fc_dec_w": raw["fc_dec_w"].T,                 # (Z, FLAT)
        "fc_dec_b": raw["fc_dec_b"].reshape(1, -1),
        "deconv1_w": _subpixel_matrix(raw["deconv1_w"]).astype(MXU_DTYPE),
        "deconv1_b": jnp.tile(raw["deconv1_b"], 4).reshape(-1, 1),
        "deconv2_w": _subpixel_matrix(raw["deconv2_w"], cout_pad=OUT_PAD).astype(MXU_DTYPE),
        "deconv2_b": jnp.tile(b2p, 4).reshape(-1, 1),
        "enc_mask": _enc_masks(),
        "dec_mask": _dec_mask(),
    }
    return p, raw


# ----------------------------------------------------------------------------
# Forward pass  (mirrors ConvolVariatinalAutoEncoder.forward)
# ----------------------------------------------------------------------------
def vae_forward(params, x, eps):
    B = x.shape[0]
    # ---- encoder prep (XLA, 1x traffic): channel-pad + mod-4 phase split of the image.
    xc = jnp.pad(x, ((0, 0), (0, CIN_PAD - IN_CH), (0, 0), (0, 0)))          # (B,8,S,S)
    pad_hi = 4 * ENC_P - IM - 3
    xp = jnp.pad(xc, ((0, 0), (0, 0), (3, pad_hi), (3, pad_hi)))             # (B,8,4P,4P)
    x4 = xp.reshape(B, CIN_PAD, ENC_P, 4, ENC_P, 4).transpose(0, 3, 5, 1, 2, 4)
    x4 = x4.reshape(B, 16, CIN_PAD, ENC_PP)
    x4 = jnp.pad(x4, ((0, 0), (0, 0), (0, 0), (0, ENC_MARGIN))).astype(MXU_DTYPE)
    h2 = encoder_forward(x4, params)                                         # (B,16,ENC_PP)

    # ---- flatten: PyTorch (c,h,w) order falls out directly (batch already leading) ----
    h_flat = h2.reshape(B, 2 * H_DIM, ENC_P, ENC_P)[:, :, :FEAT_SP, :FEAT_SP]
    h_flat = h_flat.reshape(B, FLAT)
    d_flat, mu, logvar = fc_head(h_flat, eps, params)                        # fused FC head

    # ---- decoder prep: view(B,-1,F,F) analogue + zero plane border -------------------
    d = d_flat.reshape(B, 2 * H_DIM, FEAT_SP, FEAT_SP)
    d = jnp.pad(d, ((0, 0), (0, 0), (0, 1), (0, 1))).reshape(B, 2 * H_DIM, DEC_PP)
    d = jnp.pad(d, ((0, 0), (0, 0), (0, DEC_MARGIN))).astype(MXU_DTYPE)
    out = decoder_forward(d, params)                                         # (B,16,8,PP)

    # ---- depth-to-space of the final (small) output + NCHW ---------------------------
    out = out.reshape(B, 4, 4, OUT_PAD, DEC_P, DEC_P)[:, :, :, :OUT_CH, :FEAT_SP, :FEAT_SP]
    recon = out.transpose(0, 3, 4, 1, 5, 2).reshape(B, OUT_CH, IM, IM)
    return recon, mu, logvar


# ----------------------------------------------------------------------------
# Pure-JAX reference (PyTorch semantics) for a numerical self-check
# ----------------------------------------------------------------------------
def _ref_conv2d(x, w, b, stride, padding):
    out = jax.lax.conv_general_dilated(
        x, w, (stride, stride), [(padding, padding)] * 2,
        dimension_numbers=("NCHW", "OIHW", "NCHW"),
        precision=jax.lax.Precision.HIGHEST)
    return out + b.reshape(1, -1, 1, 1)


def _ref_deconv2d(x, w, b, stride, padding, output_padding):
    B, C, H, W = x.shape
    k = w.shape[2]
    hd, wd = (H - 1) * stride + 1, (W - 1) * stride + 1
    xd = jnp.zeros((B, C, hd, wd), x.dtype).at[:, :, ::stride, ::stride].set(x)
    lo, hi = k - 1 - padding, k - 1 - padding + output_padding
    xd = jnp.pad(xd, ((0, 0), (0, 0), (lo, hi), (lo, hi)))
    w_eq = jnp.flip(w, (2, 3)).transpose(1, 0, 2, 3)
    out = jax.lax.conv_general_dilated(
        xd, w_eq, (1, 1), [(0, 0)] * 2,
        dimension_numbers=("NCHW", "OIHW", "NCHW"),
        precision=jax.lax.Precision.HIGHEST)
    return out + b.reshape(1, -1, 1, 1)


def _ref_linear(x, w, b):
    return jnp.dot(x, w.T, precision=jax.lax.Precision.HIGHEST) + b


def _ref_forward(raw, x, eps):
    h = jax.nn.relu(_ref_conv2d(x, raw["conv1_w"], raw["conv1_b"], 2, 1))
    h = jax.nn.relu(_ref_conv2d(h, raw["conv2_w"], raw["conv2_b"], 2, 1))
    h = h.reshape(h.shape[0], -1)
    h = jax.nn.relu(_ref_linear(h, raw["fc_enc_w"], raw["fc_enc_b"]))
    mu = _ref_linear(h, raw["fc_mu_w"], raw["fc_mu_b"])
    lv = _ref_linear(h, raw["fc_logvar_w"], raw["fc_logvar_b"])
    z = mu + eps * jnp.exp(0.5 * lv)
    d = jax.nn.relu(_ref_linear(z, raw["fc_dec_w"], raw["fc_dec_b"]))
    d = d.reshape(d.shape[0], -1, FEAT_SP, FEAT_SP)
    d = jax.nn.relu(_ref_deconv2d(d, raw["deconv1_w"], raw["deconv1_b"], 2, 1, 1))
    recon = jax.nn.sigmoid(_ref_deconv2d(d, raw["deconv2_w"], raw["deconv2_b"], 2, 1, 1))
    return recon, mu, lv


# ----------------------------------------------------------------------------
if __name__ == "__main__":
    key = jax.random.PRNGKey(0)
    k_x, k_eps, k_p = jax.random.split(key, 3)

    x = jax.random.normal(k_x, (BATCH, IN_CH, IM, IM), jnp.float32)   # NCHW input
    eps = jax.random.normal(k_eps, (BATCH, Z_DIM), jnp.float32)       # randn_like noise (fixed)
    params, raw = init_params(k_p)

    recon, mu, logvar = jax.jit(vae_forward)(params, x, eps)
    jax.block_until_ready((recon, mu, logvar))

    assert recon.shape == (BATCH, OUT_CH, IM, IM), recon.shape
    assert mu.shape == (BATCH, Z_DIM) and logvar.shape == (BATCH, Z_DIM)
    assert bool(jnp.all(jnp.isfinite(recon)))

    # Numerical cross-check against the pure-JAX reference of the PyTorch module.
    # Tolerances account for bf16 conv/deconv matmul inputs (f32 accumulation).
    r_ref, mu_ref, lv_ref = _ref_forward(raw, x, eps)
    assert float(jnp.max(jnp.abs(mu - mu_ref))) < 1e-2
    assert float(jnp.max(jnp.abs(logvar - lv_ref))) < 1e-2
    assert float(jnp.max(jnp.abs(recon - r_ref))) < 2e-2

    print("KERNEL_OK")
</pallas_src>

<mosaic_0001>
module attributes {stable_mosaic.version = 11 : i64} {
  func.func @_encoder_kernel(%arg0: i32, %arg1: memref<1x16x8x44xbf16, #tpu.memory_space<vmem>>, %arg2: memref<4x36xf32, #tpu.memory_space<vmem>>, %arg3: memref<8x72xbf16, #tpu.memory_space<vmem>>, %arg4: memref<8x1xf32, #tpu.memory_space<vmem>>, %arg5: memref<16x72xbf16, #tpu.memory_space<vmem>>, %arg6: memref<16x1xf32, #tpu.memory_space<vmem>>, %arg7: memref<1x16x36xf32, #tpu.memory_space<vmem>>) attributes {dimension_semantics = [#tpu.dimension_semantics<parallel>], iteration_bounds = array<i64: 2>, scalar_prefetch = 0 : i64, scratch_operands = 0 : i64, tpu.core_type = #tpu.core_type<tc>, window_params = [{transform_indices = @transform_0, window_bounds = array<i64: 1, 16, 8, 44>}, {pipeline_mode = #tpu.pipeline_mode<synchronous>, transform_indices = @transform_1, window_bounds = array<i64: 4, 36>}, {pipeline_mode = #tpu.pipeline_mode<synchronous>, transform_indices = @transform_2, window_bounds = array<i64: 8, 72>}, {pipeline_mode = #tpu.pipeline_mode<synchronous>, transform_indices = @transform_3, window_bounds = array<i64: 8, 1>}, {pipeline_mode = #tpu.pipeline_mode<synchronous>, transform_indices = @transform_4, window_bounds = array<i64: 16, 72>}, {pipeline_mode = #tpu.pipeline_mode<synchronous>, transform_indices = @transform_5, window_bounds = array<i64: 16, 1>}, {transform_indices = @transform_6, window_bounds = array<i64: 1, 16, 36>}]} {
    %c0 = arith.constant 0 : index
    %c0_0 = arith.constant 0 : index
    %c0_1 = arith.constant 0 : index
    %c0_2 = arith.constant 0 : index
    %0 = vector.load %arg1[%c0, %c0_0, %c0_1, %c0_2] : memref<1x16x8x44xbf16, #tpu.memory_space<vmem>>, vector<1x1x8x44xbf16>
    %1 = vector.shape_cast %0 : vector<1x1x8x44xbf16> to vector<8x44xbf16>
    %c0_3 = arith.constant 0 : index
    %c1 = arith.constant 1 : index
    %c0_4 = arith.constant 0 : index
    %c0_5 = arith.constant 0 : index
    %2 = vector.load %arg1[%c0_3, %c1, %c0_4, %c0_5] : memref<1x16x8x44xbf16, #tpu.memory_space<vmem>>, vector<1x1x8x44xbf16>
    %3 = vector.shape_cast %2 : vector<1x1x8x44xbf16> to vector<8x44xbf16>
    %c0_6 = arith.constant 0 : index
    %c2 = arith.constant 2 : index
    %c0_7 = arith.constant 0 : index
    %c0_8 = arith.constant 0 : index
    %4 = vector.load %arg1[%c0_6, %c2, %c0_7, %c0_8] : memref<1x16x8x44xbf16, #tpu.memory_space<vmem>>, vector<1x1x8x44xbf16>
    %5 = vector.shape_cast %4 : vector<1x1x8x44xbf16> to vector<8x44xbf16>
    %c0_9 = arith.constant 0 : index
    %c3 = arith.constant 3 : index
    %c0_10 = arith.constant 0 : index
    %c0_11 = arith.constant 0 : index
    %6 = vector.load %arg1[%c0_9, %c3, %c0_10, %c0_11] : memref<1x16x8x44xbf16, #tpu.memory_space<vmem>>, vector<1x1x8x44xbf16>
    %7 = vector.shape_cast %6 : vector<1x1x8x44xbf16> to vector<8x44xbf16>
    %c0_12 = arith.constant 0 : index
    %c4 = arith.constant 4 : index
    %c0_13 = arith.constant 0 : index
    %c0_14 = arith.constant 0 : index
    %8 = vector.load %arg1[%c0_12, %c4, %c0_13, %c0_14] : memref<1x16x8x44xbf16, #tpu.memory_space<vmem>>, vector<1x1x8x44xbf16>
    %9 = vector.shape_cast %8 : vector<1x1x8x44xbf16> to vector<8x44xbf16>
    %c0_15 = arith.constant 0 : index
    %c5 = arith.constant 5 : index
    %c0_16 = arith.constant 0 : index
    %c0_17 = arith.constant 0 : index
    %10 = vector.load %arg1[%c0_15, %c5, %c0_16, %c0_17] : memref<1x16x8x44xbf16, #tpu.memory_space<vmem>>, vector<1x1x8x44xbf16>
    %11 = vector.shape_cast %10 : vector<1x1x8x44xbf16> to vector<8x44xbf16>
    %c0_18 = arith.constant 0 : index
    %c6 = arith.constant 6 : index
    %c0_19 = arith.constant 0 : index
    %c0_20 = arith.constant 0 : index
    %12 = vector.load %arg1[%c0_18, %c6, %c0_19, %c0_20] : memref<1x16x8x44xbf16, #tpu.memory_space<vmem>>, vector<1x1x8x44xbf16>
    %13 = vector.shape_cast %12 : vector<1x1x8x44xbf16> to vector<8x44xbf16>
    %c0_21 = arith.constant 0 : index
    %c7 = arith.constant 7 : index
    %c0_22 = arith.constant 0 : index
    %c0_23 = arith.constant 0 : index
    %14 = vector.load %arg1[%c0_21, %c7, %c0_22, %c0_23] : memref<1x16x8x44xbf16, #tpu.memory_space<vmem>>, vector<1x1x8x44xbf16>
    %15 = vector.shape_cast %14 : vector<1x1x8x44xbf16> to vector<8x44xbf16>
    %c0_24 = arith.constant 0 : index
    %c8 = arith.constant 8 : index
    %c0_25 = arith.constant 0 : index
    %c0_26 = arith.constant 0 : index
    %16 = vector.load %arg1[%c0_24, %c8, %c0_25, %c0_26] : memref<1x16x8x44xbf16, #tpu.memory_space<vmem>>, vector<1x1x8x44xbf16>
    %17 = vector.shape_cast %16 : vector<1x1x8x44xbf16> to vector<8x44xbf16>
    %c0_27 = arith.constant 0 : index
    %c9 = arith.constant 9 : index
    %c0_28 = arith.constant 0 : index
    %c0_29 = arith.constant 0 : index
    %18 = vector.load %arg1[%c0_27, %c9, %c0_28, %c0_29] : memref<1x16x8x44xbf16, #tpu.memory_space<vmem>>, vector<1x1x8x44xbf16>
    %19 = vector.shape_cast %18 : vector<1x1x8x44xbf16> to vector<8x44xbf16>
    %c0_30 = arith.constant 0 : index
    %c10 = arith.constant 10 : index
    %c0_31 = arith.constant 0 : index
    %c0_32 = arith.constant 0 : index
    %20 = vector.load %arg1[%c0_30, %c10, %c0_31, %c0_32] : memref<1x16x8x44xbf16, #tpu.memory_space<vmem>>, vector<1x1x8x44xbf16>
    %21 = vector.shape_cast %20 : vector<1x1x8x44xbf16> to vector<8x44xbf16>
    %c0_33 = arith.constant 0 : index
    %c11 = arith.constant 11 : index
    %c0_34 = arith.constant 0 : index
    %c0_35 = arith.constant 0 : index
    %22 = vector.load %arg1[%c0_33, %c11, %c0_34, %c0_35] : memref<1x16x8x44xbf16, #tpu.memory_space<vmem>>, vector<1x1x8x44xbf16>
    %23 = vector.shape_cast %22 : vector<1x1x8x44xbf16> to vector<8x44xbf16>
    %c0_36 = arith.constant 0 : index
    %c12 = arith.constant 12 : index
    %c0_37 = arith.constant 0 : index
    %c0_38 = arith.constant 0 : index
    %24 = vector.load %arg1[%c0_36, %c12, %c0_37, %c0_38] : memref<1x16x8x44xbf16, #tpu.memory_space<vmem>>, vector<1x1x8x44xbf16>
    %25 = vector.shape_cast %24 : vector<1x1x8x44xbf16> to vector<8x44xbf16>
    %c0_39 = arith.constant 0 : index
    %c13 = arith.constant 13 : index
    %c0_40 = arith.constant 0 : index
    %c0_41 = arith.constant 0 : index
    %26 = vector.load %arg1[%c0_39, %c13, %c0_40, %c0_41] : memref<1x16x8x44xbf16, #tpu.memory_space<vmem>>, vector<1x1x8x44xbf16>
    %27 = vector.shape_cast %26 : vector<1x1x8x44xbf16> to vector<8x44xbf16>
    %c0_42 = arith.constant 0 : index
    %c14 = arith.constant 14 : index
    %c0_43 = arith.constant 0 : index
    %c0_44 = arith.constant 0 : index
    %28 = vector.load %arg1[%c0_42, %c14, %c0_43, %c0_44] : memref<1x16x8x44xbf16, #tpu.memory_space<vmem>>, vector<1x1x8x44xbf16>
    %29 = vector.shape_cast %28 : vector<1x1x8x44xbf16> to vector<8x44xbf16>
    %c0_45 = arith.constant 0 : index
    %c15 = arith.constant 15 : index
    %c0_46 = arith.constant 0 : index
    %c0_47 = arith.constant 0 : index
    %30 = vector.load %arg1[%c0_45, %c15, %c0_46, %c0_47] : memref<1x16x8x44xbf16, #tpu.memory_space<vmem>>, vector<1x1x8x44xbf16>
    %31 = vector.shape_cast %30 : vector<1x1x8x44xbf16> to vector<8x44xbf16>
    %32 = vector.extract_strided_slice %1 {offsets = [0, 0], sizes = [8, 36], strides = [1, 1]} : vector<8x44xbf16> to vector<8x36xbf16>
    %33 = vector.extract_strided_slice %3 {offsets = [0, 0], sizes = [8, 36], strides = [1, 1]} : vector<8x44xbf16> to vector<8x36xbf16>
    %34 = vector.extract_strided_slice %5 {offsets = [0, 0], sizes = [8, 36], strides = [1, 1]} : vector<8x44xbf16> to vector<8x36xbf16>
    %35 = vector.extract_strided_slice %9 {offsets = [0, 0], sizes = [8, 36], strides = [1, 1]} : vector<8x44xbf16> to vector<8x36xbf16>
    %36 = vector.extract_strided_slice %11 {offsets = [0, 0], sizes = [8, 36], strides = [1, 1]} : vector<8x44xbf16> to vector<8x36xbf16>
    %37 = vector.extract_strided_slice %13 {offsets = [0, 0], sizes = [8, 36], strides = [1, 1]} : vector<8x44xbf16> to vector<8x36xbf16>
    %38 = vector.extract_strided_slice %17 {offsets = [0, 0], sizes = [8, 36], strides = [1, 1]} : vector<8x44xbf16> to vector<8x36xbf16>
    %39 = vector.extract_strided_slice %19 {offsets = [0, 0], sizes = [8, 36], strides = [1, 1]} : vector<8x44xbf16> to vector<8x36xbf16>
    %40 = vector.extract_strided_slice %21 {offsets = [0, 0], sizes = [8, 36], strides = [1, 1]} : vector<8x44xbf16> to vector<8x36xbf16>
    %41 = tpu.concatenate %32, %33, %34, %35, %36, %37, %38, %39, %40 in 0 : vector<8x36xbf16>, vector<8x36xbf16>, vector<8x36xbf16>, vector<8x36xbf16>, vector<8x36xbf16>, vector<8x36xbf16>, vector<8x36xbf16>, vector<8x36xbf16>, vector<8x36xbf16> -> vector<72x36xbf16>
    %c0_48 = arith.constant 0 : index
    %c0_49 = arith.constant 0 : index
    %42 = vector.load %arg3[%c0_48, %c0_49] : memref<8x72xbf16, #tpu.memory_space<vmem>>, vector<8x72xbf16>
    %cst = arith.constant dense<0.000000e+00> : vector<8x36xf32>
    %43 = tpu.matmul %42, %41, %cst {dimension_numbers = #tpu.dot_dimension_numbers<[1], [0], [0], [1], [0, 0, 1, 1], [], []>} : vector<8x72xbf16>, vector<72x36xbf16>, vector<8x36xf32> -> vector<8x36xf32>
    %c0_50 = arith.constant 0 : index
    %c0_51 = arith.constant 0 : index
    %44 = vector.load %arg4[%c0_50, %c0_51] : memref<8x1xf32, #tpu.memory_space<vmem>>, vector<8x1xf32>
    %45 = vector.broadcast %44 : vector<8x1xf32> to vector<8x36xf32>
    %46 = arith.addf %43, %45 : vector<8x36xf32>
    %cst_52 = arith.constant 0.000000e+00 : f32
    %47 = vector.broadcast %cst_52 : f32 to vector<8x36xf32>
    %48 = arith.maximumf %46, %47 : vector<8x36xf32>
    %c0_53 = arith.constant 0 : index
    %c0_54 = arith.constant 0 : index
    %49 = vector.load %arg2[%c0_53, %c0_54] : memref<4x36xf32, #tpu.memory_space<vmem>>, vector<1x36xf32>
    %50 = vector.broadcast %49 : vector<1x36xf32> to vector<8x36xf32>
    %51 = arith.mulf %48, %50 : vector<8x36xf32>
    %52 = arith.truncf %51 : vector<8x36xf32> to vector<8x36xbf16>
    %cst_55 = arith.constant 0.000000e+00 : bf16
    %53 = vector.broadcast %cst_55 : bf16 to vector<8x8xbf16>
    %54 = tpu.concatenate %52, %53 in 1 : vector<8x36xbf16>, vector<8x8xbf16> -> vector<8x44xbf16>
    %55 = vector.extract_strided_slice %5 {offsets = [0, 0], sizes = [8, 36], strides = [1, 1]} : vector<8x44xbf16> to vector<8x36xbf16>
    %56 = vector.extract_strided_slice %7 {offsets = [0, 0], sizes = [8, 36], strides = [1, 1]} : vector<8x44xbf16> to vector<8x36xbf16>
    %57 = vector.extract_strided_slice %1 {offsets = [0, 1], sizes = [8, 36], strides = [1, 1]} : vector<8x44xbf16> to vector<8x36xbf16>
    %58 = vector.extract_strided_slice %13 {offsets = [0, 0], sizes = [8, 36], strides = [1, 1]} : vector<8x44xbf16> to vector<8x36xbf16>
    %59 = vector.extract_strided_slice %15 {offsets = [0, 0], sizes = [8, 36], strides = [1, 1]} : vector<8x44xbf16> to vector<8x36xbf16>
    %60 = vector.extract_strided_slice %9 {offsets = [0, 1], sizes = [8, 36], strides = [1, 1]} : vector<8x44xbf16> to vector<8x36xbf16>
    %61 = vector.extract_strided_slice %21 {offsets = [0, 0], sizes = [8, 36], strides = [1, 1]} : vector<8x44xbf16> to vector<8x36xbf16>
    %62 = vector.extract_strided_slice %23 {offsets = [0, 0], sizes = [8, 36], strides = [1, 1]} : vector<8x44xbf16> to vector<8x36xbf16>
    %63 = vector.extract_strided_slice %17 {offsets = [0, 1], sizes = [8, 36], strides = [1, 1]} : vector<8x44xbf16> to vector<8x36xbf16>
    %64 = tpu.concatenate %55, %56, %57, %58, %59, %60, %61, %62, %63 in 0 : vector<8x36xbf16>, vector<8x36xbf16>, vector<8x36xbf16>, vector<8x36xbf16>, vector<8x36xbf16>, vector<8x36xbf16>, vector<8x36xbf16>, vector<8x36xbf16>, vector<8x36xbf16> -> vector<72x36xbf16>
    %c0_56 = arith.constant 0 : index
    %c0_57 = arith.constant 0 : index
    %65 = vector.load %arg3[%c0_56, %c0_57] : memref<8x72xbf16, #tpu.memory_space<vmem>>, vector<8x72xbf16>
    %cst_58 = arith.constant dense<0.000000e+00> : vector<8x36xf32>
    %66 = tpu.matmul %65, %64, %cst_58 {dimension_numbers = #tpu.dot_dimension_numbers<[1], [0], [0], [1], [0, 0, 1, 1], [], []>} : vector<8x72xbf16>, vector<72x36xbf16>, vector<8x36xf32> -> vector<8x36xf32>
    %c0_59 = arith.constant 0 : index
    %c0_60 = arith.constant 0 : index
    %67 = vector.load %arg4[%c0_59, %c0_60] : memref<8x1xf32, #tpu.memory_space<vmem>>, vector<8x1xf32>
    %68 = vector.broadcast %67 : vector<8x1xf32> to vector<8x36xf32>
    %69 = arith.addf %66, %68 : vector<8x36xf32>
    %cst_61 = arith.constant 0.000000e+00 : f32
    %70 = vector.broadcast %cst_61 : f32 to vector<8x36xf32>
    %71 = arith.maximumf %69, %70 : vector<8x36xf32>
    %c1_62 = arith.constant 1 : index
    %c0_63 = arith.constant 0 : index
    %72 = vector.load %arg2[%c1_62, %c0_63] : memref<4x36xf32, #tpu.memory_space<vmem>>, vector<1x36xf32>
    %73 = vector.broadcast %72 : vector<1x36xf32> to vector<8x36xf32>
    %74 = arith.mulf %71, %73 : vector<8x36xf32>
    %75 = arith.truncf %74 : vector<8x36xf32> to vector<8x36xbf16>
    %cst_64 = arith.constant 0.000000e+00 : bf16
    %76 = vector.broadcast %cst_64 : bf16 to vector<8x8xbf16>
    %77 = tpu.concatenate %75, %76 in 1 : vector<8x36xbf16>, vector<8x8xbf16> -> vector<8x44xbf16>
    %78 = vector.extract_strided_slice %17 {offsets = [0, 0], sizes = [8, 36], strides = [1, 1]} : vector<8x44xbf16> to vector<8x36xbf16>
    %79 = vector.extract_strided_slice %19 {offsets = [0, 0], sizes = [8, 36], strides = [1, 1]} : vector<8x44xbf16> to vector<8x36xbf16>
    %80 = vector.extract_strided_slice %21 {offsets = [0, 0], sizes = [8, 36], strides = [1, 1]} : vector<8x44xbf16> to vector<8x36xbf16>
    %81 = vector.extract_strided_slice %25 {offsets = [0, 0], sizes = [8, 36], strides = [1, 1]} : vector<8x44xbf16> to vector<8x36xbf16>
    %82 = vector.extract_strided_slice %27 {offsets = [0, 0], sizes = [8, 36], strides = [1, 1]} : vector<8x44xbf16> to vector<8x36xbf16>
    %83 = vector.extract_strided_slice %29 {offsets = [0, 0], sizes = [8, 36], strides = [1, 1]} : vector<8x44xbf16> to vector<8x36xbf16>
    %84 = vector.extract_strided_slice %1 {offsets = [0, 6], sizes = [8, 36], strides = [1, 1]} : vector<8x44xbf16> to vector<8x36xbf16>
    %85 = vector.extract_strided_slice %3 {offsets = [0, 6], sizes = [8, 36], strides = [1, 1]} : vector<8x44xbf16> to vector<8x36xbf16>
    %86 = vector.extract_strided_slice %5 {offsets = [0, 6], sizes = [8, 36], strides = [1, 1]} : vector<8x44xbf16> to vector<8x36xbf16>
    %87 = tpu.concatenate %78, %79, %80, %81, %82, %83, %84, %85, %86 in 0 : vector<8x36xbf16>, vector<8x36xbf16>, vector<8x36xbf16>, vector<8x36xbf16>, vector<8x36xbf16>, vector<8x36xbf16>, vector<8x36xbf16>, vector<8x36xbf16>, vector<8x36xbf16> -> vector<72x36xbf16>
    %c0_65 = arith.constant 0 : index
    %c0_66 = arith.constant 0 : index
    %88 = vector.load %arg3[%c0_65, %c0_66] : memref<8x72xbf16, #tpu.memory_space<vmem>>, vector<8x72xbf16>
    %cst_67 = arith.constant dense<0.000000e+00> : vector<8x36xf32>
    %89 = tpu.matmul %88, %87, %cst_67 {dimension_numbers = #tpu.dot_dimension_numbers<[1], [0], [0], [1], [0, 0, 1, 1], [], []>} : vector<8x72xbf16>, vector<72x36xbf16>, vector<8x36xf32> -> vector<8x36xf32>
    %c0_68 = arith.constant 0 : index
    %c0_69 = arith.constant 0 : index
    %90 = vector.load %arg4[%c0_68, %c0_69] : memref<8x1xf32, #tpu.memory_space<vmem>>, vector<8x1xf32>
    %91 = vector.broadcast %90 : vector<8x1xf32> to vector<8x36xf32>
    %92 = arith.addf %89, %91 : vector<8x36xf32>
    %cst_70 = arith.constant 0.000000e+00 : f32
    %93 = vector.broadcast %cst_70 : f32 to vector<8x36xf32>
    %94 = arith.maximumf %92, %93 : vector<8x36xf32>
    %c2_71 = arith.constant 2 : index
    %c0_72 = arith.constant 0 : index
    %95 = vector.load %arg2[%c2_71, %c0_72] : memref<4x36xf32, #tpu.memory_space<vmem>>, vector<1x36xf32>
    %96 = vector.broadcast %95 : vector<1x36xf32> to vector<8x36xf32>
    %97 = arith.mulf %94, %96 : vector<8x36xf32>
    %98 = arith.truncf %97 : vector<8x36xf32> to vector<8x36xbf16>
    %cst_73 = arith.constant 0.000000e+00 : bf16
    %99 = vector.broadcast %cst_73 : bf16 to vector<8x8xbf16>
    %100 = tpu.concatenate %98, %99 in 1 : vector<8x36xbf16>, vector<8x8xbf16> -> vector<8x44xbf16>
    %101 = vector.extract_strided_slice %21 {offsets = [0, 0], sizes = [8, 36], strides = [1, 1]} : vector<8x44xbf16> to vector<8x36xbf16>
    %102 = vector.extract_strided_slice %23 {offsets = [0, 0], sizes = [8, 36], strides = [1, 1]} : vector<8x44xbf16> to vector<8x36xbf16>
    %103 = vector.extract_strided_slice %17 {offsets = [0, 1], sizes = [8, 36], strides = [1, 1]} : vector<8x44xbf16> to vector<8x36xbf16>
    %104 = vector.extract_strided_slice %29 {offsets = [0, 0], sizes = [8, 36], strides = [1, 1]} : vector<8x44xbf16> to vector<8x36xbf16>
    %105 = vector.extract_strided_slice %31 {offsets = [0, 0], sizes = [8, 36], strides = [1, 1]} : vector<8x44xbf16> to vector<8x36xbf16>
    %106 = vector.extract_strided_slice %25 {offsets = [0, 1], sizes = [8, 36], strides = [1, 1]} : vector<8x44xbf16> to vector<8x36xbf16>
    %107 = vector.extract_strided_slice %5 {offsets = [0, 6], sizes = [8, 36], strides = [1, 1]} : vector<8x44xbf16> to vector<8x36xbf16>
    %108 = vector.extract_strided_slice %7 {offsets = [0, 6], sizes = [8, 36], strides = [1, 1]} : vector<8x44xbf16> to vector<8x36xbf16>
    %109 = vector.extract_strided_slice %1 {offsets = [0, 7], sizes = [8, 36], strides = [1, 1]} : vector<8x44xbf16> to vector<8x36xbf16>
    %110 = tpu.concatenate %101, %102, %103, %104, %105, %106, %107, %108, %109 in 0 : vector<8x36xbf16>, vector<8x36xbf16>, vector<8x36xbf16>, vector<8x36xbf16>, vector<8x36xbf16>, vector<8x36xbf16>, vector<8x36xbf16>, vector<8x36xbf16>, vector<8x36xbf16> -> vector<72x36xbf16>
    %c0_74 = arith.constant 0 : index
    %c0_75 = arith.constant 0 : index
    %111 = vector.load %arg3[%c0_74, %c0_75] : memref<8x72xbf16, #tpu.memory_space<vmem>>, vector<8x72xbf16>
    %cst_76 = arith.constant dense<0.000000e+00> : vector<8x36xf32>
    %112 = tpu.matmul %111, %110, %cst_76 {dimension_numbers = #tpu.dot_dimension_numbers<[1], [0], [0], [1], [0, 0, 1, 1], [], []>} : vector<8x72xbf16>, vector<72x36xbf16>, vector<8x36xf32> -> vector<8x36xf32>
    %c0_77 = arith.constant 0 : index
    %c0_78 = arith.constant 0 : index
    %113 = vector.load %arg4[%c0_77, %c0_78] : memref<8x1xf32, #tpu.memory_space<vmem>>, vector<8x1xf32>
    %114 = vector.broadcast %113 : vector<8x1xf32> to vector<8x36xf32>
    %115 = arith.addf %112, %114 : vector<8x36xf32>
    %cst_79 = arith.constant 0.000000e+00 : f32
    %116 = vector.broadcast %cst_79 : f32 to vector<8x36xf32>
    %117 = arith.maximumf %115, %116 : vector<8x36xf32>
    %c3_80 = arith.constant 3 : index
    %c0_81 = arith.constant 0 : index
    %118 = vector.load %arg2[%c3_80, %c0_81] : memref<4x36xf32, #tpu.memory_space<vmem>>, vector<1x36xf32>
    %119 = vector.broadcast %118 : vector<1x36xf32> to vector<8x36xf32>
    %120 = arith.mulf %117, %119 : vector<8x36xf32>
    %121 = arith.truncf %120 : vector<8x36xf32> to vector<8x36xbf16>
    %cst_82 = arith.constant 0.000000e+00 : bf16
    %122 = vector.broadcast %cst_82 : bf16 to vector<8x8xbf16>
    %123 = tpu.concatenate %121, %122 in 1 : vector<8x36xbf16>, vector<8x8xbf16> -> vector<8x44xbf16>
    %124 = vector.extract_strided_slice %54 {offsets = [0, 0], sizes = [8, 36], strides = [1, 1]} : vector<8x44xbf16> to vector<8x36xbf16>
    %125 = vector.extract_strided_slice %77 {offsets = [0, 0], sizes = [8, 36], strides = [1, 1]} : vector<8x44xbf16> to vector<8x36xbf16>
    %126 = vector.extract_strided_slice %54 {offsets = [0, 1], sizes = [8, 36], strides = [1, 1]} : vector<8x44xbf16> to vector<8x36xbf16>
    %127 = vector.extract_strided_slice %100 {offsets = [0, 0], sizes = [8, 36], strides = [1, 1]} : vector<8x44xbf16> to vector<8x36xbf16>
    %128 = vector.extract_strided_slice %123 {offsets = [0, 0], sizes = [8, 36], strides = [1, 1]} : vector<8x44xbf16> to vector<8x36xbf16>
    %129 = vector.extract_strided_slice %100 {offsets = [0, 1], sizes = [8, 36], strides = [1, 1]} : vector<8x44xbf16> to vector<8x36xbf16>
    %130 = vector.extract_strided_slice %54 {offsets = [0, 6], sizes = [8, 36], strides = [1, 1]} : vector<8x44xbf16> to vector<8x36xbf16>
    %131 = vector.extract_strided_slice %77 {offsets = [0, 6], sizes = [8, 36], strides = [1, 1]} : vector<8x44xbf16> to vector<8x36xbf16>
    %132 = vector.extract_strided_slice %54 {offsets = [0, 7], sizes = [8, 36], strides = [1, 1]} : vector<8x44xbf16> to vector<8x36xbf16>
    %133 = tpu.concatenate %124, %125, %126, %127, %128, %129, %130, %131, %132 in 0 : vector<8x36xbf16>, vector<8x36xbf16>, vector<8x36xbf16>, vector<8x36xbf16>, vector<8x36xbf16>, vector<8x36xbf16>, vector<8x36xbf16>, vector<8x36xbf16>, vector<8x36xbf16> -> vector<72x36xbf16>
    %c0_83 = arith.constant 0 : index
    %c0_84 = arith.constant 0 : index
    %134 = vector.load %arg5[%c0_83, %c0_84] : memref<16x72xbf16, #tpu.memory_space<vmem>>, vector<16x72xbf16>
    %cst_85 = arith.constant dense<0.000000e+00> : vector<16x36xf32>
    %135 = tpu.matmul %134, %133, %cst_85 {dimension_numbers = #tpu.dot_dimension_numbers<[1], [0], [0], [1], [0, 0, 1, 1], [], []>} : vector<16x72xbf16>, vector<72x36xbf16>, vector<16x36xf32> -> vector<16x36xf32>
    %c0_86 = arith.constant 0 : index
    %c0_87 = arith.constant 0 : index
    %136 = vector.load %arg6[%c0_86, %c0_87] : memref<16x1xf32, #tpu.memory_space<vmem>>, vector<16x1xf32>
    %137 = vector.broadcast %136 : vector<16x1xf32> to vector<16x36xf32>
    %138 = arith.addf %135, %137 : vector<16x36xf32>
    %cst_88 = arith.constant 0.000000e+00 : f32
    %139 = vector.broadcast %cst_88 : f32 to vector<16x36xf32>
    %140 = arith.maximumf %138, %139 : vector<16x36xf32>
    %c0_89 = arith.constant 0 : index
    %c0_90 = arith.constant 0 : index
    %c0_91 = arith.constant 0 : index
    %141 = vector.load %arg7[%c0_89, %c0_90, %c0_91] : memref<1x16x36xf32, #tpu.memory_space<vmem>>, vector<1x16x36xf32>
    %142 = vector.shape_cast %141 : vector<1x16x36xf32> to vector<16x36xf32>
    %143 = vector.shape_cast %140 : vector<16x36xf32> to vector<1x16x36xf32>
    tpu.vector_store %arg7[%c0_89, %c0_90, %c0_91], %143 {strides = array<i32>} : memref<1x16x36xf32, #tpu.memory_space<vmem>>, vector<1x16x36xf32>,
    return
  }
  func.func @transform_0(%arg0: i32) -> (i32, i32, i32, i32) {
    %c0_i32 = arith.constant 0 : i32
    %c0_i32_0 = arith.constant 0 : i32
    %c0_i32_1 = arith.constant 0 : i32
    %c0_i32_2 = arith.constant 0 : i32
    return %arg0, %c0_i32, %c0_i32_0, %c0_i32_1 : i32, i32, i32, i32
  }
  func.func @transform_1(%arg0: i32) -> (i32, i32) {
    %c0_i32 = arith.constant 0 : i32
    %c0_i32_0 = arith.constant 0 : i32
    %c0_i32_1 = arith.constant 0 : i32
    return %c0_i32, %c0_i32_0 : i32, i32
  }
  func.func @transform_2(%arg0: i32) -> (i32, i32) {
    %c0_i32 = arith.constant 0 : i32
    %c0_i32_0 = arith.constant 0 : i32
    %c0_i32_1 = arith.constant 0 : i32
    return %c0_i32, %c0_i32_0 : i32, i32
  }
  func.func @transform_3(%arg0: i32) -> (i32, i32) {
    %c0_i32 = arith.constant 0 : i32
    %c0_i32_0 = arith.constant 0 : i32
    %c0_i32_1 = arith.constant 0 : i32
    return %c0_i32, %c0_i32_0 : i32, i32
  }
  func.func @transform_4(%arg0: i32) -> (i32, i32) {
    %c0_i32 = arith.constant 0 : i32
    %c0_i32_0 = arith.constant 0 : i32
    %c0_i32_1 = arith.constant 0 : i32
    return %c0_i32, %c0_i32_0 : i32, i32
  }
  func.func @transform_5(%arg0: i32) -> (i32, i32) {
    %c0_i32 = arith.constant 0 : i32
    %c0_i32_0 = arith.constant 0 : i32
    %c0_i32_1 = arith.constant 0 : i32
    return %c0_i32, %c0_i32_0 : i32, i32
  }
  func.func @transform_6(%arg0: i32) -> (i32, i32, i32) {
    %c0_i32 = arith.constant 0 : i32
    %c0_i32_0 = arith.constant 0 : i32
    %c0_i32_1 = arith.constant 0 : i32
    return %arg0, %c0_i32, %c0_i32_0 : i32, i32, i32
  }
}

module attributes {stable_mosaic.version = 11 : i64} {
  func.func @_fc_head_kernel(%arg0: i32, %arg1: memref<2x256xf32, #tpu.memory_space<vmem>>, %arg2: memref<256x4xf32, #tpu.memory_space<vmem>>, %arg3: memref<1x4xf32, #tpu.memory_space<vmem>>, %arg4: memref<4x2xf32, #tpu.memory_space<vmem>>, %arg5: memref<1x2xf32, #tpu.memory_space<vmem>>, %arg6: memref<4x2xf32, #tpu.memory_space<vmem>>, %arg7: memref<1x2xf32, #tpu.memory_space<vmem>>, %arg8: memref<2x2xf32, #tpu.memory_space<vmem>>, %arg9: memref<2x256xf32, #tpu.memory_space<vmem>>, %arg10: memref<1x256xf32, #tpu.memory_space<vmem>>, %arg11: memref<2x256xf32, #tpu.memory_space<vmem>>, %arg12: memref<2x2xf32, #tpu.memory_space<vmem>>, %arg13: memref<2x2xf32, #tpu.memory_space<vmem>>) attributes {dimension_semantics = [#tpu.dimension_semantics<arbitrary>], iteration_bounds = array<i64: 1>, scalar_prefetch = 0 : i64, scratch_operands = 0 : i64, tpu.core_type = #tpu.core_type<tc>, window_params = [{pipeline_mode = #tpu.pipeline_mode<synchronous>, transform_indices = @transform_0, window_bounds = array<i64: 2, 256>}, {pipeline_mode = #tpu.pipeline_mode<synchronous>, transform_indices = @transform_1, window_bounds = array<i64: 256, 4>}, {pipeline_mode = #tpu.pipeline_mode<synchronous>, transform_indices = @transform_2, window_bounds = array<i64: 1, 4>}, {pipeline_mode = #tpu.pipeline_mode<synchronous>, transform_indices = @transform_3, window_bounds = array<i64: 4, 2>}, {pipeline_mode = #tpu.pipeline_mode<synchronous>, transform_indices = @transform_4, window_bounds = array<i64: 1, 2>}, {pipeline_mode = #tpu.pipeline_mode<synchronous>, transform_indices = @transform_5, window_bounds = array<i64: 4, 2>}, {pipeline_mode = #tpu.pipeline_mode<synchronous>, transform_indices = @transform_6, window_bounds = array<i64: 1, 2>}, {pipeline_mode = #tpu.pipeline_mode<synchronous>, transform_indices = @transform_7, window_bounds = array<i64: 2, 2>}, {pipeline_mode = #tpu.pipeline_mode<synchronous>, transform_indices = @transform_8, window_bounds = array<i64: 2, 256>}, {pipeline_mode = #tpu.pipeline_mode<synchronous>, transform_indices = @transform_9, window_bounds = array<i64: 1, 256>}, {pipeline_mode = #tpu.pipeline_mode<synchronous>, transform_indices = @transform_10, window_bounds = array<i64: 2, 256>}, {pipeline_mode = #tpu.pipeline_mode<synchronous>, transform_indices = @transform_11, window_bounds = array<i64: 2, 2>}, {pipeline_mode = #tpu.pipeline_mode<synchronous>, transform_indices = @transform_12, window_bounds = array<i64: 2, 2>}]} {
    %c0 = arith.constant 0 : index
    %c0_0 = arith.constant 0 : index
    %0 = vector.load %arg1[%c0, %c0_0] : memref<2x256xf32, #tpu.memory_space<vmem>>, vector<2x256xf32>
    %c0_1 = arith.constant 0 : index
    %c0_2 = arith.constant 0 : index
    %1 = vector.load %arg2[%c0_1, %c0_2] : memref<256x4xf32, #tpu.memory_space<vmem>>, vector<256x4xf32>
    %cst = arith.constant dense<0.000000e+00> : vector<2x4xf32>
    %2 = tpu.matmul %0, %1, %cst {dimension_numbers = #tpu.dot_dimension_numbers<[1], [0], [0], [1], [0, 0, 1, 1], [], []>} : vector<2x256xf32>, vector<256x4xf32>, vector<2x4xf32> -> vector<2x4xf32>
    %c0_3 = arith.constant 0 : index
    %c0_4 = arith.constant 0 : index
    %3 = vector.load %arg3[%c0_3, %c0_4] : memref<1x4xf32, #tpu.memory_space<vmem>>, vector<1x4xf32>
    %4 = vector.broadcast %3 : vector<1x4xf32> to vector<2x4xf32>
    %5 = arith.addf %2, %4 : vector<2x4xf32>
    %cst_5 = arith.constant 0.000000e+00 : f32
    %6 = vector.broadcast %cst_5 : f32 to vector<2x4xf32>
    %7 = arith.maximumf %5, %6 : vector<2x4xf32>
    %c0_6 = arith.constant 0 : index
    %c0_7 = arith.constant 0 : index
    %8 = vector.load %arg4[%c0_6, %c0_7] : memref<4x2xf32, #tpu.memory_space<vmem>>, vector<4x2xf32>
    %cst_8 = arith.constant dense<0.000000e+00> : vector<2x2xf32>
    %9 = tpu.matmul %7, %8, %cst_8 {dimension_numbers = #tpu.dot_dimension_numbers<[1], [0], [0], [1], [0, 0, 1, 1], [], []>} : vector<2x4xf32>, vector<4x2xf32>, vector<2x2xf32> -> vector<2x2xf32>
    %c0_9 = arith.constant 0 : index
    %c0_10 = arith.constant 0 : index
    %10 = vector.load %arg5[%c0_9, %c0_10] : memref<1x2xf32, #tpu.memory_space<vmem>>, vector<1x2xf32>
    %11 = vector.broadcast %10 : vector<1x2xf32> to vector<2x2xf32>
    %12 = arith.addf %9, %11 : vector<2x2xf32>
    %c0_11 = arith.constant 0 : index
    %c0_12 = arith.constant 0 : index
    %13 = vector.load %arg6[%c0_11, %c0_12] : memref<4x2xf32, #tpu.memory_space<vmem>>, vector<4x2xf32>
    %cst_13 = arith.constant dense<0.000000e+00> : vector<2x2xf32>
    %14 = tpu.matmul %7, %13, %cst_13 {dimension_numbers = #tpu.dot_dimension_numbers<[1], [0], [0], [1], [0, 0, 1, 1], [], []>} : vector<2x4xf32>, vector<4x2xf32>, vector<2x2xf32> -> vector<2x2xf32>
    %c0_14 = arith.constant 0 : index
    %c0_15 = arith.constant 0 : index
    %15 = vector.load %arg7[%c0_14, %c0_15] : memref<1x2xf32, #tpu.memory_space<vmem>>, vector<1x2xf32>
    %16 = vector.broadcast %15 : vector<1x2xf32> to vector<2x2xf32>
    %17 = arith.addf %14, %16 : vector<2x2xf32>
    %c0_16 = arith.constant 0 : index
    %c0_17 = arith.constant 0 : index
    %18 = vector.load %arg8[%c0_16, %c0_17] : memref<2x2xf32, #tpu.memory_space<vmem>>, vector<2x2xf32>
    %cst_18 = arith.constant 5.000000e-01 : f32
    %19 = vector.broadcast %cst_18 : f32 to vector<2x2xf32>
    %20 = arith.mulf %19, %17 : vector<2x2xf32>
    %21 = math.exp %20 : vector<2x2xf32>
    %22 = arith.mulf %18, %21 : vector<2x2xf32>
    %23 = arith.addf %12, %22 : vector<2x2xf32>
    %c0_19 = arith.constant 0 : index
    %c0_20 = arith.constant 0 : index
    %24 = vector.load %arg9[%c0_19, %c0_20] : memref<2x256xf32, #tpu.memory_space<vmem>>, vector<2x256xf32>
    %cst_21 = arith.constant dense<0.000000e+00> : vector<2x256xf32>
    %25 = tpu.matmul %23, %24, %cst_21 {dimension_numbers = #tpu.dot_dimension_numbers<[1], [0], [0], [1], [0, 0, 1, 1], [], []>} : vector<2x2xf32>, vector<2x256xf32>, vector<2x256xf32> -> vector<2x256xf32>
    %c0_22 = arith.constant 0 : index
    %c0_23 = arith.constant 0 : index
    %26 = vector.load %arg10[%c0_22, %c0_23] : memref<1x256xf32, #tpu.memory_space<vmem>>, vector<1x256xf32>
    %27 = vector.broadcast %26 : vector<1x256xf32> to vector<2x256xf32>
    %28 = arith.addf %25, %27 : vector<2x256xf32>
    %cst_24 = arith.constant 0.000000e+00 : f32
    %29 = vector.broadcast %cst_24 : f32 to vector<2x256xf32>
    %30 = arith.maximumf %28, %29 : vector<2x256xf32>
    %c0_25 = arith.constant 0 : index
    %c0_26 = arith.constant 0 : index
    %31 = vector.load %arg11[%c0_25, %c0_26] : memref<2x256xf32, #tpu.memory_space<vmem>>, vector<2x256xf32>
    tpu.vector_store %arg11[%c0_25, %c0_26], %30 {strides = array<i32>} : memref<2x256xf32, #tpu.memory_space<vmem>>, vector<2x256xf32>,
    %c0_27 = arith.constant 0 : index
    %c0_28 = arith.constant 0 : index
    %32 = vector.load %arg12[%c0_27, %c0_28] : memref<2x2xf32, #tpu.memory_space<vmem>>, vector<2x2xf32>
    tpu.vector_store %arg12[%c0_27, %c0_28], %12 {strides = array<i32>} : memref<2x2xf32, #tpu.memory_space<vmem>>, vector<2x2xf32>,
    %c0_29 = arith.constant 0 : index
    %c0_30 = arith.constant 0 : index
    %33 = vector.load %arg13[%c0_29, %c0_30] : memref<2x2xf32, #tpu.memory_space<vmem>>, vector<2x2xf32>
    tpu.vector_store %arg13[%c0_29, %c0_30], %17 {strides = array<i32>} : memref<2x2xf32, #tpu.memory_space<vmem>>, vector<2x2xf32>,
    return
  }
  func.func @transform_0(%arg0: i32) -> (i32, i32) {
    %c0_i32 = arith.constant 0 : i32
    %c0_i32_0 = arith.constant 0 : i32
    %c0_i32_1 = arith.constant 0 : i32
    return %c0_i32, %c0_i32_0 : i32, i32
  }
  func.func @transform_1(%arg0: i32) -> (i32, i32) {
    %c0_i32 = arith.constant 0 : i32
    %c0_i32_0 = arith.constant 0 : i32
    %c0_i32_1 = arith.constant 0 : i32
    return %c0_i32, %c0_i32_0 : i32, i32
  }
  func.func @transform_2(%arg0: i32) -> (i32, i32) {
    %c0_i32 = arith.constant 0 : i32
    %c0_i32_0 = arith.constant 0 : i32
    %c0_i32_1 = arith.constant 0 : i32
    return %c0_i32, %c0_i32_0 : i32, i32
  }
  func.func @transform_3(%arg0: i32) -> (i32, i32) {
    %c0_i32 = arith.constant 0 : i32
    %c0_i32_0 = arith.constant 0 : i32
    %c0_i32_1 = arith.constant 0 : i32
    return %c0_i32, %c0_i32_0 : i32, i32
  }
  func.func @transform_4(%arg0: i32) -> (i32, i32) {
    %c0_i32 = arith.constant 0 : i32
    %c0_i32_0 = arith.constant 0 : i32
    %c0_i32_1 = arith.constant 0 : i32
    return %c0_i32, %c0_i32_0 : i32, i32
  }
  func.func @transform_5(%arg0: i32) -> (i32, i32) {
    %c0_i32 = arith.constant 0 : i32
    %c0_i32_0 = arith.constant 0 : i32
    %c0_i32_1 = arith.constant 0 : i32
    return %c0_i32, %c0_i32_0 : i32, i32
  }
  func.func @transform_6(%arg0: i32) -> (i32, i32) {
    %c0_i32 = arith.constant 0 : i32
    %c0_i32_0 = arith.constant 0 : i32
    %c0_i32_1 = arith.constant 0 : i32
    return %c0_i32, %c0_i32_0 : i32, i32
  }
  func.func @transform_7(%arg0: i32) -> (i32, i32) {
    %c0_i32 = arith.constant 0 : i32
    %c0_i32_0 = arith.constant 0 : i32
    %c0_i32_1 = arith.constant 0 : i32
    return %c0_i32, %c0_i32_0 : i32, i32
  }
  func.func @transform_8(%arg0: i32) -> (i32, i32) {
    %c0_i32 = arith.constant 0 : i32
    %c0_i32_0 = arith.constant 0 : i32
    %c0_i32_1 = arith.constant 0 : i32
    return %c0_i32, %c0_i32_0 : i32, i32
  }
  func.func @transform_9(%arg0: i32) -> (i32, i32) {
    %c0_i32 = arith.constant 0 : i32
    %c0_i32_0 = arith.constant 0 : i32
    %c0_i32_1 = arith.constant 0 : i32
    return %c0_i32, %c0_i32_0 : i32, i32
  }
  func.func @transform_10(%arg0: i32) -> (i32, i32) {
    %c0_i32 = arith.constant 0 : i32
    %c0_i32_0 = arith.constant 0 : i32
    %c0_i32_1 = arith.constant 0 : i32
    return %c0_i32, %c0_i32_0 : i32, i32
  }
  func.func @transform_11(%arg0: i32) -> (i32, i32) {
    %c0_i32 = arith.constant 0 : i32
    %c0_i32_0 = arith.constant 0 : i32
    %c0_i32_1 = arith.constant 0 : i32
    return %c0_i32, %c0_i32_0 : i32, i32
  }
  func.func @transform_12(%arg0: i32) -> (i32, i32) {
    %c0_i32 = arith.constant 0 : i32
    %c0_i32_0 = arith.constant 0 : i32
    %c0_i32_1 = arith.constant 0 : i32
    return %c0_i32, %c0_i32_0 : i32, i32
  }
}

module attributes {stable_mosaic.version = 11 : i64} {
  func.func @_decoder_kernel(%arg0: i32, %arg1: memref<1x16x33xbf16, #tpu.memory_space<vmem>>, %arg2: memref<1x25xf32, #tpu.memory_space<vmem>>, %arg3: memref<32x64xbf16, #tpu.memory_space<vmem>>, %arg4: memref<32x1xf32, #tpu.memory_space<vmem>>, %arg5: memref<32x32xbf16, #tpu.memory_space<vmem>>, %arg6: memref<32x1xf32, #tpu.memory_space<vmem>>, %arg7: memref<1x16x8x25xf32, #tpu.memory_space<vmem>>) attributes {dimension_semantics = [#tpu.dimension_semantics<parallel>], iteration_bounds = array<i64: 2>, scalar_prefetch = 0 : i64, scratch_operands = 0 : i64, tpu.core_type = #tpu.core_type<tc>, window_params = [{transform_indices = @transform_0, window_bounds = array<i64: 1, 16, 33>}, {pipeline_mode = #tpu.pipeline_mode<synchronous>, transform_indices = @transform_1, window_bounds = array<i64: 1, 25>}, {pipeline_mode = #tpu.pipeline_mode<synchronous>, transform_indices = @transform_2, window_bounds = array<i64: 32, 64>}, {pipeline_mode = #tpu.pipeline_mode<synchronous>, transform_indices = @transform_3, window_bounds = array<i64: 32, 1>}, {pipeline_mode = #tpu.pipeline_mode<synchronous>, transform_indices = @transform_4, window_bounds = array<i64: 32, 32>}, {pipeline_mode = #tpu.pipeline_mode<synchronous>, transform_indices = @transform_5, window_bounds = array<i64: 32, 1>}, {transform_indices = @transform_6, window_bounds = array<i64: 1, 16, 8, 25>}]} {
    %c0 = arith.constant 0 : index
    %c0_0 = arith.constant 0 : index
    %c0_1 = arith.constant 0 : index
    %0 = vector.load %arg1[%c0, %c0_0, %c0_1] : memref<1x16x33xbf16, #tpu.memory_space<vmem>>, vector<1x16x33xbf16>
    %1 = vector.shape_cast %0 : vector<1x16x33xbf16> to vector<16x33xbf16>
    %2 = vector.extract_strided_slice %1 {offsets = [0, 0], sizes = [16, 25], strides = [1, 1]} : vector<16x33xbf16> to vector<16x25xbf16>
    %3 = vector.extract_strided_slice %1 {offsets = [0, 1], sizes = [16, 25], strides = [1, 1]} : vector<16x33xbf16> to vector<16x25xbf16>
    %4 = vector.extract_strided_slice %1 {offsets = [0, 5], sizes = [16, 25], strides = [1, 1]} : vector<16x33xbf16> to vector<16x25xbf16>
    %5 = vector.extract_strided_slice %1 {offsets = [0, 6], sizes = [16, 25], strides = [1, 1]} : vector<16x33xbf16> to vector<16x25xbf16>
    %6 = tpu.concatenate %2, %3, %4, %5 in 0 : vector<16x25xbf16>, vector<16x25xbf16>, vector<16x25xbf16>, vector<16x25xbf16> -> vector<64x25xbf16>
    %c0_2 = arith.constant 0 : index
    %c0_3 = arith.constant 0 : index
    %7 = vector.load %arg3[%c0_2, %c0_3] : memref<32x64xbf16, #tpu.memory_space<vmem>>, vector<32x64xbf16>
    %cst = arith.constant dense<0.000000e+00> : vector<32x25xf32>
    %8 = tpu.matmul %7, %6, %cst {dimension_numbers = #tpu.dot_dimension_numbers<[1], [0], [0], [1], [0, 0, 1, 1], [], []>} : vector<32x64xbf16>, vector<64x25xbf16>, vector<32x25xf32> -> vector<32x25xf32>
    %c0_4 = arith.constant 0 : index
    %c0_5 = arith.constant 0 : index
    %9 = vector.load %arg4[%c0_4, %c0_5] : memref<32x1xf32, #tpu.memory_space<vmem>>, vector<32x1xf32>
    %10 = vector.broadcast %9 : vector<32x1xf32> to vector<32x25xf32>
    %11 = arith.addf %8, %10 : vector<32x25xf32>
    %cst_6 = arith.constant 0.000000e+00 : f32
    %12 = vector.broadcast %cst_6 : f32 to vector<32x25xf32>
    %13 = arith.maximumf %11, %12 : vector<32x25xf32>
    %c0_7 = arith.constant 0 : index
    %c0_8 = arith.constant 0 : index
    %14 = vector.load %arg2[%c0_7, %c0_8] : memref<1x25xf32, #tpu.memory_space<vmem>>, vector<1x25xf32>
    %15 = vector.broadcast %14 : vector<1x25xf32> to vector<32x25xf32>
    %16 = arith.mulf %13, %15 : vector<32x25xf32>
    %17 = arith.truncf %16 : vector<32x25xf32> to vector<32x25xbf16>
    %18 = vector.extract_strided_slice %17 {offsets = [0, 0], sizes = [8, 25], strides = [1, 1]} : vector<32x25xbf16> to vector<8x25xbf16>
    %cst_9 = arith.constant 0.000000e+00 : bf16
    %19 = vector.broadcast %cst_9 : bf16 to vector<8x8xbf16>
    %20 = tpu.concatenate %18, %19 in 1 : vector<8x25xbf16>, vector<8x8xbf16> -> vector<8x33xbf16>
    %21 = vector.extract_strided_slice %17 {offsets = [8, 0], sizes = [8, 25], strides = [1, 1]} : vector<32x25xbf16> to vector<8x25xbf16>
    %cst_10 = arith.constant 0.000000e+00 : bf16
    %22 = vector.broadcast %cst_10 : bf16 to vector<8x8xbf16>
    %23 = tpu.concatenate %21, %22 in 1 : vector<8x25xbf16>, vector<8x8xbf16> -> vector<8x33xbf16>
    %24 = vector.extract_strided_slice %17 {offsets = [16, 0], sizes = [8, 25], strides = [1, 1]} : vector<32x25xbf16> to vector<8x25xbf16>
    %cst_11 = arith.constant 0.000000e+00 : bf16
    %25 = vector.broadcast %cst_11 : bf16 to vector<8x8xbf16>
    %26 = tpu.concatenate %24, %25 in 1 : vector<8x25xbf16>, vector<8x8xbf16> -> vector<8x33xbf16>
    %27 = vector.extract_strided_slice %17 {offsets = [24, 0], sizes = [8, 25], strides = [1, 1]} : vector<32x25xbf16> to vector<8x25xbf16>
    %cst_12 = arith.constant 0.000000e+00 : bf16
    %28 = vector.broadcast %cst_12 : bf16 to vector<8x8xbf16>
    %29 = tpu.concatenate %27, %28 in 1 : vector<8x25xbf16>, vector<8x8xbf16> -> vector<8x33xbf16>
    %30 = vector.extract_strided_slice %20 {offsets = [0, 0], sizes = [8, 25], strides = [1, 1]} : vector<8x33xbf16> to vector<8x25xbf16>
    %31 = vector.extract_strided_slice %23 {offsets = [0, 0], sizes = [8, 25], strides = [1, 1]} : vector<8x33xbf16> to vector<8x25xbf16>
    %32 = vector.extract_strided_slice %26 {offsets = [0, 0], sizes = [8, 25], strides = [1, 1]} : vector<8x33xbf16> to vector<8x25xbf16>
    %33 = vector.extract_strided_slice %29 {offsets = [0, 0], sizes = [8, 25], strides = [1, 1]} : vector<8x33xbf16> to vector<8x25xbf16>
    %34 = tpu.concatenate %30, %31, %32, %33 in 0 : vector<8x25xbf16>, vector<8x25xbf16>, vector<8x25xbf16>, vector<8x25xbf16> -> vector<32x25xbf16>
    %c0_13 = arith.constant 0 : index
    %c0_14 = arith.constant 0 : index
    %35 = vector.load %arg5[%c0_13, %c0_14] : memref<32x32xbf16, #tpu.memory_space<vmem>>, vector<32x32xbf16>
    %cst_15 = arith.constant dense<0.000000e+00> : vector<32x25xf32>
    %36 = tpu.matmul %35, %34, %cst_15 {dimension_numbers = #tpu.dot_dimension_numbers<[1], [0], [0], [1], [0, 0, 1, 1], [], []>} : vector<32x32xbf16>, vector<32x25xbf16>, vector<32x25xf32> -> vector<32x25xf32>
    %c0_16 = arith.constant 0 : index
    %c0_17 = arith.constant 0 : index
    %37 = vector.load %arg6[%c0_16, %c0_17] : memref<32x1xf32, #tpu.memory_space<vmem>>, vector<32x1xf32>
    %38 = vector.broadcast %37 : vector<32x1xf32> to vector<32x25xf32>
    %39 = arith.addf %36, %38 : vector<32x25xf32>
    %cst_18 = arith.constant 0.000000e+00 : f32
    %40 = vector.broadcast %cst_18 : f32 to vector<32x25xf32>
    %41 = arith.subf %40, %39 : vector<32x25xf32>
    %42 = math.exp %41 : vector<32x25xf32>
    %cst_19 = arith.constant 1.000000e+00 : f32
    %43 = vector.broadcast %cst_19 : f32 to vector<32x25xf32>
    %44 = arith.addf %43, %42 : vector<32x25xf32>
    %cst_20 = arith.constant 1.000000e+00 : f32
    %45 = vector.broadcast %cst_20 : f32 to vector<32x25xf32>
    %46 = arith.divf %45, %44 : vector<32x25xf32>
    %47 = vector.extract_strided_slice %46 {offsets = [0, 0], sizes = [8, 25], strides = [1, 1]} : vector<32x25xf32> to vector<8x25xf32>
    %c0_21 = arith.constant 0 : index
    %c0_22 = arith.constant 0 : index
    %c0_23 = arith.constant 0 : index
    %c0_24 = arith.constant 0 : index
    %48 = vector.load %arg7[%c0_21, %c0_22, %c0_23, %c0_24] : memref<1x16x8x25xf32, #tpu.memory_space<vmem>>, vector<1x1x8x25xf32>
    %49 = vector.shape_cast %48 : vector<1x1x8x25xf32> to vector<8x25xf32>
    %50 = vector.shape_cast %47 : vector<8x25xf32> to vector<1x1x8x25xf32>
    tpu.vector_store %arg7[%c0_21, %c0_22, %c0_23, %c0_24], %50 {strides = array<i32>} : memref<1x16x8x25xf32, #tpu.memory_space<vmem>>, vector<1x1x8x25xf32>,
    %51 = vector.extract_strided_slice %46 {offsets = [8, 0], sizes = [8, 25], strides = [1, 1]} : vector<32x25xf32> to vector<8x25xf32>
    %c0_25 = arith.constant 0 : index
    %c1 = arith.constant 1 : index
    %c0_26 = arith.constant 0 : index
    %c0_27 = arith.constant 0 : index
    %52 = vector.load %arg7[%c0_25, %c1, %c0_26, %c0_27] : memref<1x16x8x25xf32, #tpu.memory_space<vmem>>, vector<1x1x8x25xf32>
    %53 = vector.shape_cast %52 : vector<1x1x8x25xf32> to vector<8x25xf32>
    %54 = vector.shape_cast %51 : vector<8x25xf32> to vector<1x1x8x25xf32>
    tpu.vector_store %arg7[%c0_25, %c1, %c0_26, %c0_27], %54 {strides = array<i32>} : memref<1x16x8x25xf32, #tpu.memory_space<vmem>>, vector<1x1x8x25xf32>,
    %55 = vector.extract_strided_slice %46 {offsets = [16, 0], sizes = [8, 25], strides = [1, 1]} : vector<32x25xf32> to vector<8x25xf32>
    %c0_28 = arith.constant 0 : index
    %c4 = arith.constant 4 : index
    %c0_29 = arith.constant 0 : index
    %c0_30 = arith.constant 0 : index
    %56 = vector.load %arg7[%c0_28, %c4, %c0_29, %c0_30] : memref<1x16x8x25xf32, #tpu.memory_space<vmem>>, vector<1x1x8x25xf32>
    %57 = vector.shape_cast %56 : vector<1x1x8x25xf32> to vector<8x25xf32>
    %58 = vector.shape_cast %55 : vector<8x25xf32> to vector<1x1x8x25xf32>
    tpu.vector_store %arg7[%c0_28, %c4, %c0_29, %c0_30], %58 {strides = array<i32>} : memref<1x16x8x25xf32, #tpu.memory_space<vmem>>, vector<1x1x8x25xf32>,
    %59 = vector.extract_strided_slice %46 {offsets = [24, 0], sizes = [8, 25], strides = [1, 1]} : vector<32x25xf32> to vector<8x25xf32>
    %c0_31 = arith.constant 0 : index
    %c5 = arith.constant 5 : index
    %c0_32 = arith.constant 0 : index
    %c0_33 = arith.constant 0 : index
    %60 = vector.load %arg7[%c0_31, %c5, %c0_32, %c0_33] : memref<1x16x8x25xf32, #tpu.memory_space<vmem>>, vector<1x1x8x25xf32>
    %61 = vector.shape_cast %60 : vector<1x1x8x25xf32> to vector<8x25xf32>
    %62 = vector.shape_cast %59 : vector<8x25xf32> to vector<1x1x8x25xf32>
    tpu.vector_store %arg7[%c0_31, %c5, %c0_32, %c0_33], %62 {strides = array<i32>} : memref<1x16x8x25xf32, #tpu.memory_space<vmem>>, vector<1x1x8x25xf32>,
    %63 = vector.extract_strided_slice %23 {offsets = [0, 0], sizes = [8, 25], strides = [1, 1]} : vector<8x33xbf16> to vector<8x25xbf16>
    %64 = vector.extract_strided_slice %20 {offsets = [0, 1], sizes = [8, 25], strides = [1, 1]} : vector<8x33xbf16> to vector<8x25xbf16>
    %65 = vector.extract_strided_slice %29 {offsets = [0, 0], sizes = [8, 25], strides = [1, 1]} : vector<8x33xbf16> to vector<8x25xbf16>
    %66 = vector.extract_strided_slice %26 {offsets = [0, 1], sizes = [8, 25], strides = [1, 1]} : vector<8x33xbf16> to vector<8x25xbf16>
    %67 = tpu.concatenate %63, %64, %65, %66 in 0 : vector<8x25xbf16>, vector<8x25xbf16>, vector<8x25xbf16>, vector<8x25xbf16> -> vector<32x25xbf16>
    %c0_34 = arith.constant 0 : index
    %c0_35 = arith.constant 0 : index
    %68 = vector.load %arg5[%c0_34, %c0_35] : memref<32x32xbf16, #tpu.memory_space<vmem>>, vector<32x32xbf16>
    %cst_36 = arith.constant dense<0.000000e+00> : vector<32x25xf32>
    %69 = tpu.matmul %68, %67, %cst_36 {dimension_numbers = #tpu.dot_dimension_numbers<[1], [0], [0], [1], [0, 0, 1, 1], [], []>} : vector<32x32xbf16>, vector<32x25xbf16>, vector<32x25xf32> -> vector<32x25xf32>
    %c0_37 = arith.constant 0 : index
    %c0_38 = arith.constant 0 : index
    %70 = vector.load %arg6[%c0_37, %c0_38] : memref<32x1xf32, #tpu.memory_space<vmem>>, vector<32x1xf32>
    %71 = vector.broadcast %70 : vector<32x1xf32> to vector<32x25xf32>
    %72 = arith.addf %69, %71 : vector<32x25xf32>
    %cst_39 = arith.constant 0.000000e+00 : f32
    %73 = vector.broadcast %cst_39 : f32 to vector<32x25xf32>
    %74 = arith.subf %73, %72 : vector<32x25xf32>
    %75 = math.exp %74 : vector<32x25xf32>
    %cst_40 = arith.constant 1.000000e+00 : f32
    %76 = vector.broadcast %cst_40 : f32 to vector<32x25xf32>
    %77 = arith.addf %76, %75 : vector<32x25xf32>
    %cst_41 = arith.constant 1.000000e+00 : f32
    %78 = vector.broadcast %cst_41 : f32 to vector<32x25xf32>
    %79 = arith.divf %78, %77 : vector<32x25xf32>
    %80 = vector.extract_strided_slice %79 {offsets = [0, 0], sizes = [8, 25], strides = [1, 1]} : vector<32x25xf32> to vector<8x25xf32>
    %c0_42 = arith.constant 0 : index
    %c2 = arith.constant 2 : index
    %c0_43 = arith.constant 0 : index
    %c0_44 = arith.constant 0 : index
    %81 = vector.load %arg7[%c0_42, %c2, %c0_43, %c0_44] : memref<1x16x8x25xf32, #tpu.memory_space<vmem>>, vector<1x1x8x25xf32>
    %82 = vector.shape_cast %81 : vector<1x1x8x25xf32> to vector<8x25xf32>
    %83 = vector.shape_cast %80 : vector<8x25xf32> to vector<1x1x8x25xf32>
    tpu.vector_store %arg7[%c0_42, %c2, %c0_43, %c0_44], %83 {strides = array<i32>} : memref<1x16x8x25xf32, #tpu.memory_space<vmem>>, vector<1x1x8x25xf32>,
    %84 = vector.extract_strided_slice %79 {offsets = [8, 0], sizes = [8, 25], strides = [1, 1]} : vector<32x25xf32> to vector<8x25xf32>
    %c0_45 = arith.constant 0 : index
    %c3 = arith.constant 3 : index
    %c0_46 = arith.constant 0 : index
    %c0_47 = arith.constant 0 : index
    %85 = vector.load %arg7[%c0_45, %c3, %c0_46, %c0_47] : memref<1x16x8x25xf32, #tpu.memory_space<vmem>>, vector<1x1x8x25xf32>
    %86 = vector.shape_cast %85 : vector<1x1x8x25xf32> to vector<8x25xf32>
    %87 = vector.shape_cast %84 : vector<8x25xf32> to vector<1x1x8x25xf32>
    tpu.vector_store %arg7[%c0_45, %c3, %c0_46, %c0_47], %87 {strides = array<i32>} : memref<1x16x8x25xf32, #tpu.memory_space<vmem>>, vector<1x1x8x25xf32>,
    %88 = vector.extract_strided_slice %79 {offsets = [16, 0], sizes = [8, 25], strides = [1, 1]} : vector<32x25xf32> to vector<8x25xf32>
    %c0_48 = arith.constant 0 : index
    %c6 = arith.constant 6 : index
    %c0_49 = arith.constant 0 : index
    %c0_50 = arith.constant 0 : index
    %89 = vector.load %arg7[%c0_48, %c6, %c0_49, %c0_50] : memref<1x16x8x25xf32, #tpu.memory_space<vmem>>, vector<1x1x8x25xf32>
    %90 = vector.shape_cast %89 : vector<1x1x8x25xf32> to vector<8x25xf32>
    %91 = vector.shape_cast %88 : vector<8x25xf32> to vector<1x1x8x25xf32>
    tpu.vector_store %arg7[%c0_48, %c6, %c0_49, %c0_50], %91 {strides = array<i32>} : memref<1x16x8x25xf32, #tpu.memory_space<vmem>>, vector<1x1x8x25xf32>,
    %92 = vector.extract_strided_slice %79 {offsets = [24, 0], sizes = [8, 25], strides = [1, 1]} : vector<32x25xf32> to vector<8x25xf32>
    %c0_51 = arith.constant 0 : index
    %c7 = arith.constant 7 : index
    %c0_52 = arith.constant 0 : index
    %c0_53 = arith.constant 0 : index
    %93 = vector.load %arg7[%c0_51, %c7, %c0_52, %c0_53] : memref<1x16x8x25xf32, #tpu.memory_space<vmem>>, vector<1x1x8x25xf32>
    %94 = vector.shape_cast %93 : vector<1x1x8x25xf32> to vector<8x25xf32>
    %95 = vector.shape_cast %92 : vector<8x25xf32> to vector<1x1x8x25xf32>
    tpu.vector_store %arg7[%c0_51, %c7, %c0_52, %c0_53], %95 {strides = array<i32>} : memref<1x16x8x25xf32, #tpu.memory_space<vmem>>, vector<1x1x8x25xf32>,
    %96 = vector.extract_strided_slice %26 {offsets = [0, 0], sizes = [8, 25], strides = [1, 1]} : vector<8x33xbf16> to vector<8x25xbf16>
    %97 = vector.extract_strided_slice %29 {offsets = [0, 0], sizes = [8, 25], strides = [1, 1]} : vector<8x33xbf16> to vector<8x25xbf16>
    %98 = vector.extract_strided_slice %20 {offsets = [0, 5], sizes = [8, 25], strides = [1, 1]} : vector<8x33xbf16> to vector<8x25xbf16>
    %99 = vector.extract_strided_slice %23 {offsets = [0, 5], sizes = [8, 25], strides = [1, 1]} : vector<8x33xbf16> to vector<8x25xbf16>
    %100 = tpu.concatenate %96, %97, %98, %99 in 0 : vector<8x25xbf16>, vector<8x25xbf16>, vector<8x25xbf16>, vector<8x25xbf16> -> vector<32x25xbf16>
    %c0_54 = arith.constant 0 : index
    %c0_55 = arith.constant 0 : index
    %101 = vector.load %arg5[%c0_54, %c0_55] : memref<32x32xbf16, #tpu.memory_space<vmem>>, vector<32x32xbf16>
    %cst_56 = arith.constant dense<0.000000e+00> : vector<32x25xf32>
    %102 = tpu.matmul %101, %100, %cst_56 {dimension_numbers = #tpu.dot_dimension_numbers<[1], [0], [0], [1], [0, 0, 1, 1], [], []>} : vector<32x32xbf16>, vector<32x25xbf16>, vector<32x25xf32> -> vector<32x25xf32>
    %c0_57 = arith.constant 0 : index
    %c0_58 = arith.constant 0 : index
    %103 = vector.load %arg6[%c0_57, %c0_58] : memref<32x1xf32, #tpu.memory_space<vmem>>, vector<32x1xf32>
    %104 = vector.broadcast %103 : vector<32x1xf32> to vector<32x25xf32>
    %105 = arith.addf %102, %104 : vector<32x25xf32>
    %cst_59 = arith.constant 0.000000e+00 : f32
    %106 = vector.broadcast %cst_59 : f32 to vector<32x25xf32>
    %107 = arith.subf %106, %105 : vector<32x25xf32>
    %108 = math.exp %107 : vector<32x25xf32>
    %cst_60 = arith.constant 1.000000e+00 : f32
    %109 = vector.broadcast %cst_60 : f32 to vector<32x25xf32>
    %110 = arith.addf %109, %108 : vector<32x25xf32>
    %cst_61 = arith.constant 1.000000e+00 : f32
    %111 = vector.broadcast %cst_61 : f32 to vector<32x25xf32>
    %112 = arith.divf %111, %110 : vector<32x25xf32>
    %113 = vector.extract_strided_slice %112 {offsets = [0, 0], sizes = [8, 25], strides = [1, 1]} : vector<32x25xf32> to vector<8x25xf32>
    %c0_62 = arith.constant 0 : index
    %c8 = arith.constant 8 : index
    %c0_63 = arith.constant 0 : index
    %c0_64 = arith.constant 0 : index
    %114 = vector.load %arg7[%c0_62, %c8, %c0_63, %c0_64] : memref<1x16x8x25xf32, #tpu.memory_space<vmem>>, vector<1x1x8x25xf32>
    %115 = vector.shape_cast %114 : vector<1x1x8x25xf32> to vector<8x25xf32>
    %116 = vector.shape_cast %113 : vector<8x25xf32> to vector<1x1x8x25xf32>
    tpu.vector_store %arg7[%c0_62, %c8, %c0_63, %c0_64], %116 {strides = array<i32>} : memref<1x16x8x25xf32, #tpu.memory_space<vmem>>, vector<1x1x8x25xf32>,
    %117 = vector.extract_strided_slice %112 {offsets = [8, 0], sizes = [8, 25], strides = [1, 1]} : vector<32x25xf32> to vector<8x25xf32>
    %c0_65 = arith.constant 0 : index
    %c9 = arith.constant 9 : index
    %c0_66 = arith.constant 0 : index
    %c0_67 = arith.constant 0 : index
    %118 = vector.load %arg7[%c0_65, %c9, %c0_66, %c0_67] : memref<1x16x8x25xf32, #tpu.memory_space<vmem>>, vector<1x1x8x25xf32>
    %119 = vector.shape_cast %118 : vector<1x1x8x25xf32> to vector<8x25xf32>
    %120 = vector.shape_cast %117 : vector<8x25xf32> to vector<1x1x8x25xf32>
    tpu.vector_store %arg7[%c0_65, %c9, %c0_66, %c0_67], %120 {strides = array<i32>} : memref<1x16x8x25xf32, #tpu.memory_space<vmem>>, vector<1x1x8x25xf32>,
    %121 = vector.extract_strided_slice %112 {offsets = [16, 0], sizes = [8, 25], strides = [1, 1]} : vector<32x25xf32> to vector<8x25xf32>
    %c0_68 = arith.constant 0 : index
    %c12 = arith.constant 12 : index
    %c0_69 = arith.constant 0 : index
    %c0_70 = arith.constant 0 : index
    %122 = vector.load %arg7[%c0_68, %c12, %c0_69, %c0_70] : memref<1x16x8x25xf32, #tpu.memory_space<vmem>>, vector<1x1x8x25xf32>
    %123 = vector.shape_cast %122 : vector<1x1x8x25xf32> to vector<8x25xf32>
    %124 = vector.shape_cast %121 : vector<8x25xf32> to vector<1x1x8x25xf32>
    tpu.vector_store %arg7[%c0_68, %c12, %c0_69, %c0_70], %124 {strides = array<i32>} : memref<1x16x8x25xf32, #tpu.memory_space<vmem>>, vector<1x1x8x25xf32>,
    %125 = vector.extract_strided_slice %112 {offsets = [24, 0], sizes = [8, 25], strides = [1, 1]} : vector<32x25xf32> to vector<8x25xf32>
    %c0_71 = arith.constant 0 : index
    %c13 = arith.constant 13 : index
    %c0_72 = arith.constant 0 : index
    %c0_73 = arith.constant 0 : index
    %126 = vector.load %arg7[%c0_71, %c13, %c0_72, %c0_73] : memref<1x16x8x25xf32, #tpu.memory_space<vmem>>, vector<1x1x8x25xf32>
    %127 = vector.shape_cast %126 : vector<1x1x8x25xf32> to vector<8x25xf32>
    %128 = vector.shape_cast %125 : vector<8x25xf32> to vector<1x1x8x25xf32>
    tpu.vector_store %arg7[%c0_71, %c13, %c0_72, %c0_73], %128 {strides = array<i32>} : memref<1x16x8x25xf32, #tpu.memory_space<vmem>>, vector<1x1x8x25xf32>,
    %129 = vector.extract_strided_slice %29 {offsets = [0, 0], sizes = [8, 25], strides = [1, 1]} : vector<8x33xbf16> to vector<8x25xbf16>
    %130 = vector.extract_strided_slice %26 {offsets = [0, 1], sizes = [8, 25], strides = [1, 1]} : vector<8x33xbf16> to vector<8x25xbf16>
    %131 = vector.extract_strided_slice %23 {offsets = [0, 5], sizes = [8, 25], strides = [1, 1]} : vector<8x33xbf16> to vector<8x25xbf16>
    %132 = vector.extract_strided_slice %20 {offsets = [0, 6], sizes = [8, 25], strides = [1, 1]} : vector<8x33xbf16> to vector<8x25xbf16>
    %133 = tpu.concatenate %129, %130, %131, %132 in 0 : vector<8x25xbf16>, vector<8x25xbf16>, vector<8x25xbf16>, vector<8x25xbf16> -> vector<32x25xbf16>
    %c0_74 = arith.constant 0 : index
    %c0_75 = arith.constant 0 : index
    %134 = vector.load %arg5[%c0_74, %c0_75] : memref<32x32xbf16, #tpu.memory_space<vmem>>, vector<32x32xbf16>
    %cst_76 = arith.constant dense<0.000000e+00> : vector<32x25xf32>
    %135 = tpu.matmul %134, %133, %cst_76 {dimension_numbers = #tpu.dot_dimension_numbers<[1], [0], [0], [1], [0, 0, 1, 1], [], []>} : vector<32x32xbf16>, vector<32x25xbf16>, vector<32x25xf32> -> vector<32x25xf32>
    %c0_77 = arith.constant 0 : index
    %c0_78 = arith.constant 0 : index
    %136 = vector.load %arg6[%c0_77, %c0_78] : memref<32x1xf32, #tpu.memory_space<vmem>>, vector<32x1xf32>
    %137 = vector.broadcast %136 : vector<32x1xf32> to vector<32x25xf32>
    %138 = arith.addf %135, %137 : vector<32x25xf32>
    %cst_79 = arith.constant 0.000000e+00 : f32
    %139 = vector.broadcast %cst_79 : f32 to vector<32x25xf32>
    %140 = arith.subf %139, %138 : vector<32x25xf32>
    %141 = math.exp %140 : vector<32x25xf32>
    %cst_80 = arith.constant 1.000000e+00 : f32
    %142 = vector.broadcast %cst_80 : f32 to vector<32x25xf32>
    %143 = arith.addf %142, %141 : vector<32x25xf32>
    %cst_81 = arith.constant 1.000000e+00 : f32
    %144 = vector.broadcast %cst_81 : f32 to vector<32x25xf32>
    %145 = arith.divf %144, %143 : vector<32x25xf32>
    %146 = vector.extract_strided_slice %145 {offsets = [0, 0], sizes = [8, 25], strides = [1, 1]} : vector<32x25xf32> to vector<8x25xf32>
    %c0_82 = arith.constant 0 : index
    %c10 = arith.constant 10 : index
    %c0_83 = arith.constant 0 : index
    %c0_84 = arith.constant 0 : index
    %147 = vector.load %arg7[%c0_82, %c10, %c0_83, %c0_84] : memref<1x16x8x25xf32, #tpu.memory_space<vmem>>, vector<1x1x8x25xf32>
    %148 = vector.shape_cast %147 : vector<1x1x8x25xf32> to vector<8x25xf32>
    %149 = vector.shape_cast %146 : vector<8x25xf32> to vector<1x1x8x25xf32>
    tpu.vector_store %arg7[%c0_82, %c10, %c0_83, %c0_84], %149 {strides = array<i32>} : memref<1x16x8x25xf32, #tpu.memory_space<vmem>>, vector<1x1x8x25xf32>,
    %150 = vector.extract_strided_slice %145 {offsets = [8, 0], sizes = [8, 25], strides = [1, 1]} : vector<32x25xf32> to vector<8x25xf32>
    %c0_85 = arith.constant 0 : index
    %c11 = arith.constant 11 : index
    %c0_86 = arith.constant 0 : index
    %c0_87 = arith.constant 0 : index
    %151 = vector.load %arg7[%c0_85, %c11, %c0_86, %c0_87] : memref<1x16x8x25xf32, #tpu.memory_space<vmem>>, vector<1x1x8x25xf32>
    %152 = vector.shape_cast %151 : vector<1x1x8x25xf32> to vector<8x25xf32>
    %153 = vector.shape_cast %150 : vector<8x25xf32> to vector<1x1x8x25xf32>
    tpu.vector_store %arg7[%c0_85, %c11, %c0_86, %c0_87], %153 {strides = array<i32>} : memref<1x16x8x25xf32, #tpu.memory_space<vmem>>, vector<1x1x8x25xf32>,
    %154 = vector.extract_strided_slice %145 {offsets = [16, 0], sizes = [8, 25], strides = [1, 1]} : vector<32x25xf32> to vector<8x25xf32>
    %c0_88 = arith.constant 0 : index
    %c14 = arith.constant 14 : index
    %c0_89 = arith.constant 0 : index
    %c0_90 = arith.constant 0 : index
    %155 = vector.load %arg7[%c0_88, %c14, %c0_89, %c0_90] : memref<1x16x8x25xf32, #tpu.memory_space<vmem>>, vector<1x1x8x25xf32>
    %156 = vector.shape_cast %155 : vector<1x1x8x25xf32> to vector<8x25xf32>
    %157 = vector.shape_cast %154 : vector<8x25xf32> to vector<1x1x8x25xf32>
    tpu.vector_store %arg7[%c0_88, %c14, %c0_89, %c0_90], %157 {strides = array<i32>} : memref<1x16x8x25xf32, #tpu.memory_space<vmem>>, vector<1x1x8x25xf32>,
    %158 = vector.extract_strided_slice %145 {offsets = [24, 0], sizes = [8, 25], strides = [1, 1]} : vector<32x25xf32> to vector<8x25xf32>
    %c0_91 = arith.constant 0 : index
    %c15 = arith.constant 15 : index
    %c0_92 = arith.constant 0 : index
    %c0_93 = arith.constant 0 : index
    %159 = vector.load %arg7[%c0_91, %c15, %c0_92, %c0_93] : memref<1x16x8x25xf32, #tpu.memory_space<vmem>>, vector<1x1x8x25xf32>
    %160 = vector.shape_cast %159 : vector<1x1x8x25xf32> to vector<8x25xf32>
    %161 = vector.shape_cast %158 : vector<8x25xf32> to vector<1x1x8x25xf32>
    tpu.vector_store %arg7[%c0_91, %c15, %c0_92, %c0_93], %161 {strides = array<i32>} : memref<1x16x8x25xf32, #tpu.memory_space<vmem>>, vector<1x1x8x25xf32>,
    return
  }
  func.func @transform_0(%arg0: i32) -> (i32, i32, i32) {
    %c0_i32 = arith.constant 0 : i32
    %c0_i32_0 = arith.constant 0 : i32
    %c0_i32_1 = arith.constant 0 : i32
    return %arg0, %c0_i32, %c0_i32_0 : i32, i32, i32
  }
  func.func @transform_1(%arg0: i32) -> (i32, i32) {
    %c0_i32 = arith.constant 0 : i32
    %c0_i32_0 = arith.constant 0 : i32
    %c0_i32_1 = arith.constant 0 : i32
    return %c0_i32, %c0_i32_0 : i32, i32
  }
  func.func @transform_2(%arg0: i32) -> (i32, i32) {
    %c0_i32 = arith.constant 0 : i32
    %c0_i32_0 = arith.constant 0 : i32
    %c0_i32_1 = arith.constant 0 : i32
    return %c0_i32, %c0_i32_0 : i32, i32
  }
  func.func @transform_3(%arg0: i32) -> (i32, i32) {
    %c0_i32 = arith.constant 0 : i32
    %c0_i32_0 = arith.constant 0 : i32
    %c0_i32_1 = arith.constant 0 : i32
    return %c0_i32, %c0_i32_0 : i32, i32
  }
  func.func @transform_4(%arg0: i32) -> (i32, i32) {
    %c0_i32 = arith.constant 0 : i32
    %c0_i32_0 = arith.constant 0 : i32
    %c0_i32_1 = arith.constant 0 : i32
    return %c0_i32, %c0_i32_0 : i32, i32
  }
  func.func @transform_5(%arg0: i32) -> (i32, i32) {
    %c0_i32 = arith.constant 0 : i32
    %c0_i32_0 = arith.constant 0 : i32
    %c0_i32_1 = arith.constant 0 : i32
    return %c0_i32, %c0_i32_0 : i32, i32
  }
  func.func @transform_6(%arg0: i32) -> (i32, i32, i32, i32) {
    %c0_i32 = arith.constant 0 : i32
    %c0_i32_0 = arith.constant 0 : i32
    %c0_i32_1 = arith.constant 0 : i32
    %c0_i32_2 = arith.constant 0 : i32
    return %arg0, %c0_i32, %c0_i32_0, %c0_i32_1 : i32, i32, i32, i32
  }
}

</mosaic_0001>

<bundles_post_ra>
// kernel: vae_forward.3
= control target key start
LH: loop header
LB: loop body
LE: loop exit
PB: predicated region body
PF: predicated region fallthrough
CT: control target
= control target key end

     0   :  { %s990_s21 = smov 0   ;;  %s1139_s0 = inlined_call_operand.vmem [shape: bf16[2,16,8,44], index: 0, kind: input, shape index: {}]   ;;  %s1140_s1 = inlined_call_operand.vmem [shape: f32[4,36], index: 1, kind: input, shape index: {}]   ;;  %s1141_s2 = inlined_call_operand.vmem [shape: bf16[8,72], index: 2, kind: input, shape index: {}]   ;;  %s1142_s3 = inlined_call_operand.vmem [shape: f32[8,1], index: 3, kind: input, shape index: {}]   ;;  %s1143_s4 = inlined_call_operand.vmem [shape: bf16[16,72], index: 4, kind: input, shape index: {}]   ;;  %s1144_s5 = inlined_call_operand.vmem [shape: f32[16,1], index: 5, kind: input, shape index: {}]   ;;  %s1145_s6 = inlined_call_operand.vmem [shape: f32[2,16,36], index: 6, kind: output, shape index: {}]  }
   0x1 LB: > { %s764_s22 = sadd.s32 4294967295, %s947_s21   ;;  %p768_p0 = scmp.ge.s32.totalorder %s947_s21, 1  ;;  %s947_s21 = sphi %s990_s21, %s16_s21  }
   0x2   : > { %p212_p1 = scmp.lt.s32.totalorder %s947_s21, 3 }
   0x4   : > { %p213_p2 = pnand %p768_p0, %p212_p1 }
   0x5   : > { %p242_p3 = scmp.lt.s32.totalorder (!%p213_p2), %s764_s22, 1  ;;  %v949_v0 = vmov (!%p213_p2), 0.0   ;;  %vm950_vm0 = vmmov (!%p213_p2), 0   ;;  %v951_v1 = vmov (!%p213_p2), 0   ;;  %vm296_vm1 = vcmask (!%p213_p2), 1043456   ;;  %s952_s27 = smov (!%p213_p2), 122  }
   0x6   : > { %216 = sbr.rel (%p213_p2) target bundleno = 715 (0x2cb), region = 44  ;;  %843 = vmatprep.subr.bf16.mxu0 (!%p213_p2), %v949_v0  ;;  %853 = vmatprep.mubr.msk.bf16.mxu0 (!%p213_p2), %vm950_vm0, %v949_v0  ;;  %s953_s28 = smov (!%p213_p2), 127   ;;  %v314_v23 = vld [vmem:[%s1142_s3] sm:$0xff] (!%p213_p2)  ;;  %vm320_vm2 = vcmask (!%p213_p2), 588800   ;;  %vm375_vm3 = vcmask (!%p213_p2), 293888  }
   0x7   : > { %927 = vset.pattern.permute.xlu1 (!%p213_p2), %v951_v1  ;;  %857 = vmatprep.subr.bf16.mxu1 (!%p213_p2), %v949_v0  ;;  %s954_s7 = smov (!%p213_p2), 121   ;;  %v313_v25 = vld [vmem:[%s1141_s2] sm:$0xf] (!%p213_p2) }
   0x8   : > { %867 = vmatprep.mubr.msk.bf16.mxu1 (!%p213_p2), %vm950_vm0, %v949_v0  ;;  %928 = vset.pattern.permute.xlu0 (!%p213_p2), %v951_v1  ;;  %v793_v54 = vld [vmem:[%s1140_s1] ss:$0 sm:$0xff] (!%p213_p2)  ;;  %v804_v1 = vld [vmem:[%s1140_s1 + $0x2] ss:$0 sm:$0xff] (!%p213_p2) }
   0xd   : > { %s1147_s22 = smov (!%p242_p3, %s764_s22), 1 }
   0xe   : > { %s811_s23 = sshll.u32 %s1147_s22, 6 }
   0xf   : > { %s1010_s26 = scalar_lea.vmem %s1139_s0, %s811_s23 }
  0x10   : > { %v253_v2 = vld [vmem:[%s1010_s26] sm:$0xf]  ;;  %v930_v3 = vld [vmem:[%s1010_s26 + $0x4] ss:$0 sps:$4 sm:$0xff]   ;;  %v931_v5 = vld [vmem:[%s1010_s26 + $0x10] ss:$0 sps:$4 sm:$0xff]  }
  0x11   : > { %v795_v4 = vcombine.low %v253_v2, %v253_v2  ;;  %v299_v6 = vsel %vm296_vm1, %v253_v2, %v930_v3  ;;  %v774_v7 = vld [vmem:[%s1010_s26 + $0x8] sm:$0xf]  ;;  %v780_v8 = vld [vmem:[%s1010_s26 + $0x20] sm:$0xf]  ;;  %v935_v9 = vld [vmem:[%s1010_s26 + $0xc] ss:$0 sps:$4 sm:$0xff]  }
  0x12   : > { %844 = vmatpush3.bf16.msra.mxu0 %v299_v6  ;;  %v303_v10 = vsel %vm296_vm1, %v774_v7, %v931_v5  ;;  %v934_v11 = vld [vmem:[%s1010_s26 + $0x18] ss:$0 sps:$4 sm:$0xff]   ;;  %v777_v12 = vld [vmem:[%s1010_s26 + $0x14] sm:$0xf]  ;;  %v398_v13 = vsel %vm296_vm1, %v774_v7, %v935_v9  ;;  %v797_v14 = vcombine.low %v780_v8, %v780_v8  ;;  %v802_v15 = vcombine.low %v774_v7, %v774_v7  ;;  %v939_v16 = vld [vmem:[%s1010_s26 + $0x2c] ss:$0 sps:$4 sm:$0xff]  }
  0x13   : > { %469 = vrot.lane.b32.xlu1 %v795_v4, %s952_s27  ;;  %385 = vrot.lane.b32.xlu0 %v795_v4, %s953_s28  ;;  %v307_v17 = vsel %vm296_vm1, %v777_v12, %v934_v11  ;;  %v936_v18 = vld [vmem:[%s1010_s26 + $0x24] ss:$0 sps:$4 sm:$0xff]   ;;  %v782_v19 = vld [vmem:[%s1010_s26 + $0x28] sm:$0xf] }
  0x14   : > { %845 = vmatprep.subr.bf16.mxu0 %v949_v0  ;;  %858 = vmatpush3.bf16.msra.mxu1 %v398_v13  ;;  %v408_v20 = vsel %vm296_vm1, %v782_v19, %v939_v16  ;;  %v937_v21 = vld [vmem:[%s1010_s26 + $0x30] ss:$0 sps:$4 sm:$0xff]   ;;  %v311_v22 = vsel %vm296_vm1, %v780_v8, %v936_v18  ;;  %v325_v24 = vsel %vm296_vm1, %v782_v19, 0  ;;  %v938_v27 = vld [vmem:[%s1010_s26 + $0x38] ss:$0 sps:$4 sm:$0xff]  }
  0x15   : > { %859 = vmatprep.subr.bf16.mxu1 %v949_v0  ;;  %v479_v26 = vsel %vm296_vm1, %v782_v19, %v937_v21  ;;  %v785_v28 = vld [vmem:[%s1010_s26 + $0x34] sm:$0xf]  ;;  %v779_v33 = vld [vmem:[%s1010_s26 + $0x1c] sm:$0xf] }
  0x16   : > { %846 = vmatpush3.bf16.msra.mxu0 %v303_v10  ;;  %v483_v29 = vsel %vm296_vm1, %v785_v28, %v938_v27  ;;  %v787_v42 = vld [vmem:[%s1010_s26 + $0x3c] sm:$0xf]  ;;  %s812_s26 = sshll.u32 %s1147_s22, 4 }
  0x17   : > { %471 = vrot.lane.b32.xlu1 %v930_v3, %s952_s27  ;;  %387 = vrot.lane.b32.xlu0 %v931_v5, %s953_s28  ;;  %s251_s29 = scalar_lea.vmem %s1145_s6, %s812_s26 }
  0x18   : > { %847 = vmatprep.subr.bf16.mxu0 %v949_v0 }
  0x1a   : > { %848 = vmatpush3.bf16.msra.mxu0 %v307_v17 }
  0x1b   : > { %395 = vrot.lane.b32.xlu1 %v797_v14, %s953_s28  ;;  %476 = vrot.lane.b32.xlu0 %v802_v15, %s952_s27 }
  0x1c   : > { %849 = vmatprep.subr.bf16.mxu0 %v949_v0 }
  0x1e   : > { %850 = vmatpush3.bf16.msra.mxu0 %v311_v22 }
  0x1f   : > { %544 = vrot.lane.b32.xlu1 %v935_v9, %s952_s27  ;;  %542 = vrot.lane.b32.xlu0 %v937_v21, %s953_s28  ;;  %v799_v9 = vld [vmem:[%s1140_s1 + $0x1] ss:$0 sm:$0xff] }
  0x20   : > { %851 = vmatprep.subr.bf16.mxu0 %v949_v0 }
  0x22   : > { %852 = vmatpush3.bf16.msra.mxu0 %v325_v24 }
  0x23   : > { %546 = vrot.lane.b32.xlu0 %v795_v4, %s954_s7  ;;  %317 = vperm.xlu1 %927, %v314_v23   ;;  %v642_v23 = vld [vmem:[%s1144_s5 + $0x8] sm:$0xff] }
  0x24   : > { %871 = vmatprep.subr.bf16.mxu0 %v949_v0 }
  0x25   : > { %854 = vmatmul.mubr.msk.bf16.vlgmr.msra.gmra.mrb[0].mxu0 %vm320_vm2, %v313_v25 }
  0x26   : > { %872 = vmatpush3.bf16.msra.mxu0 %v311_v22  ;;  %881 = vmatprep.mubr.msk.bf16.mxu0 %vm950_vm0, %v949_v0  ;;  %v641_v22 = vld [vmem:[%s1144_s5] sm:$0xff] }
  0x27   : > { %873 = vmatprep.subr.bf16.mxu0 %v949_v0 }
  0x2a   : > { %874 = vmatpush3.bf16.msra.mxu0 %v479_v26 }
  0x2b   : > { %875 = vmatprep.subr.bf16.mxu0 %v949_v0 }
  0x2e   : > { %876 = vmatpush3.bf16.msra.mxu0 %v483_v29 }
  0x2f   : > { %877 = vmatprep.subr.bf16.mxu0 %v949_v0 }
  0x85   : > { %v470_v30 = vpop.permute.xlu1 %469  ;;  %v386_v31 = vpop.permute.xlu0 %385 }
  0x86   : > { %v401_v32 = vsel %vm296_vm1, %v386_v31, %v934_v11  ;;  %v806_v31 = vld [vmem:[%s1140_s1 + $0x3] ss:$0 sm:$0xff] }
  0x87   : > { %860 = vmatpush3.bf16.msra.mxu1 %v401_v32 }
  0x88   : > { %861 = vmatprep.subr.bf16.mxu1 %v949_v0 }
  0x89   : > { %v472_v34 = vpop.permute.xlu1 %471  ;;  %v388_v35 = vpop.permute.xlu0 %387 }
  0x8a   : > { %v487_v36 = vsel %vm296_vm1, %v470_v30, %v472_v34  ;;  %v405_v37 = vsel %vm296_vm1, %v779_v33, %v388_v35 }
  0x8b   : > { %862 = vmatpush3.bf16.msra.mxu1 %v405_v37  ;;  %878 = vmatpush3.bf16.msra.mxu0 %v487_v36 }
  0x8c   : > { %863 = vmatprep.subr.bf16.mxu1 %v949_v0  ;;  %879 = vmatprep.subr.bf16.mxu0 %v949_v0 }
  0x8d   : > { %v477_v38 = vpop.permute.xlu0 %476  ;;  %v396_v40 = vpop.permute.xlu1 %395 }
  0x8e   : > { %v490_v39 = vsel %vm296_vm1, %v477_v38, 0  ;;  %v411_v41 = vsel %vm296_vm1, %v396_v40, 0  ;;  %v548_v44 = vsel %vm296_vm1, %v396_v40, %v938_v27 }
  0x8f   : > { %864 = vmatpush3.bf16.msra.mxu1 %v408_v20  ;;  %880 = vmatpush3.bf16.msra.mxu0 %v490_v39 }
  0x90   : > { %865 = vmatprep.subr.bf16.mxu1 %v949_v0  ;;  %899 = vmatprep.subr.bf16.mxu0 %v949_v0 }
  0x91   : > { %v543_v43 = vpop.permute.xlu0 %542  ;;  %v545_v46 = vpop.permute.xlu1 %544 }
  0x92   : > { %882 = vmatmul.mubr.msk.bf16.vlgmr.msra.gmra.mrb[4].mxu0 %vm320_vm2, %v313_v25  ;;  %v552_v45 = vsel %vm296_vm1, %v787_v42, %v543_v43  ;;  %v555_v48 = vsel %vm296_vm1, %v477_v38, %v545_v46  ;;  %v940_v42 = vld [vmem:[%s1143_s4] sm:$0xff]  }
  0x93   : > { %866 = vmatpush3.bf16.msra.mxu1 %v411_v41  ;;  %909 = vmatprep.mubr.msk.bf16.mxu0 %vm950_vm0, %v949_v0 }
  0x94   : > { %885 = vmatprep.subr.bf16.mxu1 %v949_v0 }
  0x95   : > { %v547_v47 = vpop.permute.xlu0 %546 }
  0x96   : > { %868 = vmatmul.mubr.msk.bf16.vlgmr.msra.gmra.mrb[0].mxu1 %vm320_vm2, %v313_v25  ;;  %v558_v49 = vsel %vm296_vm1, %v547_v47, 0 }
  0x97   : > { %886 = vmatpush3.bf16.msra.mxu1 %v408_v20  ;;  %895 = vmatprep.mubr.msk.bf16.mxu1 %vm950_vm0, %v949_v0 }
  0x98   : > { %887 = vmatprep.subr.bf16.mxu1 %v949_v0 }
  0x9b   : > { %888 = vmatpush3.bf16.msra.mxu1 %v548_v44 }
  0x9c   : > { %889 = vmatprep.subr.bf16.mxu1 %v949_v0 }
  0x9f   : > { %890 = vmatpush3.bf16.msra.mxu1 %v552_v45 }
  0xa0   : > { %891 = vmatprep.subr.bf16.mxu1 %v949_v0 }
  0xa2   : > { %v318_v50 = vpop.permute.xlu1 %317 }
  0xa3   : > { %892 = vmatpush3.bf16.msra.mxu1 %v555_v48 }
  0xa4   : > { %893 = vmatprep.subr.bf16.mxu1 %v949_v0 }
  0xa7   : > { %894 = vmatpush3.bf16.msra.mxu1 %v558_v49 }
  0xaa   : > { %896 = vmatmul.mubr.msk.bf16.vlgmr.msra.gmra.mrb[4].mxu1 %vm320_vm2, %v313_v25 }
  0xf8   : > { %v361_v51 = vpop.f32.mrb[0].mxu0 }
  0xf9   : > { %v362_v52 = vadd.f32 %v361_v51, %v318_v50  ;;  %v855_v53 = vpop.f32.mrb[1].mxu0 }
  0xfa   : > { %v364_v55 = vpop.f32.mrb[2].mxu0 }
  0xfb   : > { %v367_v56 = vmax.f32 %v362_v52, 0.0  ;;  %v856_v57 = vpop.f32.mrb[3].mxu0 }
  0xfd   : > { %v373_v58 = vmul.f32 %v793_v54, %v367_v56 }
  0xff   : > { %v374_v59 = vpack.c.bf16 %v373_v58, %v373_v58 }
 0x101   : > { %v378_v60 = vsel %vm375_vm3, %v374_v59, 0 }
 0x102   : > { %613 = vrot.lane.b32.xlu0 %v378_v60, %s953_s28 }
 0x106   : > { %619 = vrot.lane.b32.xlu0 %v378_v60, %s952_s27 }
 0x10a   : > { %623 = vrot.lane.b32.xlu0 %v378_v60, %s954_s7 }
 0x10e   : > { %650 = vperm.xlu0 %928, %v642_v23  }
 0x165   : > { %v526_v61 = vpop.f32.mrb[4].mxu0 }
 0x166   : > { %v527_v62 = vadd.f32 %v526_v61, %v318_v50  ;;  %v883_v63 = vpop.f32.mrb[5].mxu0 }
 0x167   : > { %v529_v2 = vpop.f32.mrb[6].mxu0 }
 0x168   : > { %v532_v3 = vmax.f32 %v527_v62, 0.0  ;;  %v884_v4 = vpop.f32.mrb[7].mxu0 }
 0x169   : > { %v447_v5 = vpop.f32.mrb[0].mxu1 }
 0x16a   : > { %v538_v6 = vmul.f32 %v804_v1, %v532_v3  ;;  %v448_v7 = vadd.f32 %v447_v5, %v318_v50  ;;  %v869_v8 = vpop.f32.mrb[1].mxu1 }
 0x16b   : > { %v450_v10 = vpop.f32.mrb[2].mxu1 }
 0x16c   : > { %v539_v11 = vpack.c.bf16 %v538_v6, %v538_v6  ;;  %v453_v12 = vmax.f32 %v448_v7, 0.0  ;;  %v870_v13 = vpop.f32.mrb[3].mxu1 }
 0x16e   : > { %v459_v14 = vmul.f32 %v799_v9, %v453_v12  ;;  %v541_v15 = vsel %vm375_vm3, %v539_v11, 0 }
 0x16f   : > { %v616_v16 = vrot.slane %v541_v15, 4 }
 0x170   : > { %v460_v17 = vpack.c.bf16 %v459_v14, %v459_v14 }
 0x171   : > { %617 = vrot.lane.b32.xlu1 %v616_v16, %s953_s28 }
 0x172   : > { %v462_v18 = vsel %vm375_vm3, %v460_v17, 0 }
 0x173   : > { %v611_v19 = vrot.slane %v462_v18, 4 }
 0x174   : > { %v614_v21 = vpop.permute.xlu0 %613 }
 0x175   : > { %621 = vrot.lane.b32.xlu1 %v611_v19, %s952_s27  ;;  %v626_v20 = vsel %vm296_vm1, %v378_v60, %v611_v19  ;;  %v630_v24 = vsel %vm296_vm1, %v614_v21, %v616_v16 }
 0x176   : > { %900 = vmatpush3.bf16.msra.mxu0 %v626_v20 }
 0x177   : > { %901 = vmatprep.subr.bf16.mxu0 %v949_v0 }
 0x178   : > { %v620_v34 = vpop.permute.xlu0 %619 }
 0x179   : > { %645 = vperm.xlu1 %927, %v641_v22  }
 0x17a   : > { %902 = vmatpush3.bf16.msra.mxu0 %v630_v24 }
 0x17b   : > { %903 = vmatprep.subr.bf16.mxu0 %v949_v0 }
 0x17c   : > { %v624_v40 = vpop.permute.xlu0 %623 }
 0x17d   : > { %v594_v25 = vpop.f32.mrb[4].mxu1  ;;  %v662_v41 = vsel %vm296_vm1, %v624_v40, 0 }
 0x17e   : > { %v897_v26 = vpop.f32.mrb[5].mxu1  ;;  %v595_v29 = vadd.f32 %v594_v25, %v318_v50 }
 0x17f   : > { %v597_v27 = vpop.f32.mrb[6].mxu1 }
 0x180   : > { %v898_v28 = vpop.f32.mrb[7].mxu1  ;;  %v600_v30 = vmax.f32 %v595_v29, 0.0 }
 0x182   : > { %v606_v32 = vmul.f32 %v806_v31, %v600_v30 }
 0x184   : > { %v607_v33 = vpack.c.bf16 %v606_v32, %v606_v32 }
 0x186   : > { %v609_v35 = vsel %vm375_vm3, %v607_v33, 0 }
 0x18d   : > { %v651_v45 = vpop.permute.xlu0 %650 }
 0x1e3   : > { %v618_v36 = vpop.permute.xlu1 %617 }
 0x1e4   : > { %v633_v37 = vsel %vm296_vm1, %v609_v35, %v618_v36 }
 0x1e5   : > { %904 = vmatpush3.bf16.msra.mxu0 %v633_v37 }
 0x1e6   : > { %905 = vmatprep.subr.bf16.mxu0 %v949_v0 }
 0x1e7   : > { %v622_v38 = vpop.permute.xlu1 %621 }
 0x1e8   : > { %v637_v39 = vsel %vm296_vm1, %v620_v34, %v622_v38 }
 0x1e9   : > { %906 = vmatpush3.bf16.msra.mxu0 %v637_v39 }
 0x1ea   : > { %907 = vmatprep.subr.bf16.mxu0 %v949_v0 }
 0x1ed   : > { %908 = vmatpush3.bf16.msra.mxu0 %v662_v41 }
 0x1f0   : > { %910 = vmatmul.mubr.msk.bf16.vlgmr.msra.gmra.mrb[8].mxu0 %vm320_vm2, %v940_v42 }
 0x1f8   : > { %v646_v43 = vpop.permute.xlu1 %645 }
 0x2c3   : > { %v698_v44 = vpop.f32.mrb[8].mxu0 }
 0x2c4   : > { %v699_v46 = vadd.f32 %v698_v44, %v646_v43  ;;  %v911_v47 = vpop.f32.mrb[9].mxu0 }
 0x2c5   : > { %v701_v0 = vpop.f32.mrb[10].mxu0 }
 0x2c6   : > { %v705_v48 = vmax.f32 %v699_v46, 0.0  ;;  %v702_v49 = vadd.f32 %v701_v0, %v651_v45  ;;  %v912_v50 = vpop.f32.mrb[11].mxu0 }
 0x2c8   : > { %707 = vst.msk [vmem:[%s251_s29] sm:$0xff] %vm375_vm3, %v705_v48  ;;  %v706_v51 = vmax.f32 %v702_v49, 0.0 }
 0x2ca   : > { %708 = vst.msk [vmem:[%s251_s29 + $0x8] sm:$0xff] %vm375_vm3, %v706_v51 }
 0x2cb PF: > { %s16_s21 = sadd.s32 1, %s947_s21  }
 0x2cc   : > { %p13_p4 = scmp.ge.s32.totalorder %s16_s21, 4  }
 0x2ce   :  { %15 = sbr.rel (!%p13_p4) target bundleno = 1 (0x1), region = 89 }

// kernel: vae_forward.4
= control target key start
LH: loop header
LB: loop body
LE: loop exit
PB: predicated region body
PF: predicated region fallthrough
CT: control target
= control target key end

     0   :  { %18 = vsyncpa [#allocation3], 0  ;;  %s853_s0 = inlined_call_operand.vmem [shape: f32[2,256], index: 0, kind: input, shape index: {}]   ;;  %s854_s1 = inlined_call_operand.vmem [shape: f32[256,4], index: 1, kind: input, shape index: {}]   ;;  %s855_s2 = inlined_call_operand.vmem [shape: f32[1,4], index: 2, kind: input, shape index: {}]   ;;  %s856_s3 = inlined_call_operand.vmem [shape: f32[4,2], index: 3, kind: input, shape index: {}]   ;;  %s857_s4 = inlined_call_operand.vmem [shape: f32[1,2], index: 4, kind: input, shape index: {}]   ;;  %s858_s5 = inlined_call_operand.vmem [shape: f32[4,2], index: 5, kind: input, shape index: {}]   ;;  %s859_s6 = inlined_call_operand.vmem [shape: f32[1,2], index: 6, kind: input, shape index: {}]   ;;  %s860_s7 = inlined_call_operand.vmem [shape: f32[2,2], index: 7, kind: input, shape index: {}]   ;;  %s861_s8 = inlined_call_operand.vmem [shape: f32[2,256], index: 8, kind: input, shape index: {}]   ;;  %s862_s9 = inlined_call_operand.vmem [shape: f32[1,256], index: 9, kind: input, shape index: {}]   ;;  %s863_s10 = inlined_call_operand.vmem [shape: f32[2,256], index: 10, kind: output, shape index: {0}]   ;;  %s864_s11 = inlined_call_operand.hbm [shape: f32[2,2], index: 11, kind: output, shape index: {1}]   ;;  %s865_s12 = inlined_call_operand.hbm [shape: f32[2,2], index: 12, kind: output, shape index: {2}]  }
   0x1   :  { %v57_v0 = vld [vmem:[%s854_s1 + $0x80] sm:$0xff]  ;;  %v58_v1 = vld [vmem:[%s854_s1 + $0x88] sm:$0xff]  ;;  %v59_v5 = vld [vmem:[%s854_s1 + $0x90] sm:$0xff] }
   0x2   :  { %v41_v2 = vld [vmem:[%s854_s1] sm:$0xff]  ;;  %v548_v3 = vpack.c.bf16 %v58_v1, %v57_v0  ;;  %v42_v4 = vld [vmem:[%s854_s1 + $0x8] sm:$0xff]  ;;  %v60_v6 = vld [vmem:[%s854_s1 + $0x98] sm:$0xff] }
   0x3   :  { %v550_v7 = vpack.c.bf16 %v42_v4, %v41_v2  ;;  %v552_v8 = vpack.c.bf16 %v60_v6, %v59_v5  ;;  %v43_v9 = vld [vmem:[%s854_s1 + $0x10] sm:$0xff]  ;;  %v44_v10 = vld [vmem:[%s854_s1 + $0x18] sm:$0xff]  ;;  %v61_v11 = vld [vmem:[%s854_s1 + $0xa0] sm:$0xff] }
   0x4   :  { %549 = vmatprep.subr.bf16.mxu0 %v548_v3  ;;  %v62_v12 = vld [vmem:[%s854_s1 + $0xa8] sm:$0xff]  ;;  %v554_v13 = vpack.c.bf16 %v44_v10, %v43_v9  ;;  %v45_v15 = vld [vmem:[%s854_s1 + $0x20] sm:$0xff]  ;;  %v63_v17 = vld [vmem:[%s854_s1 + $0xb0] sm:$0xff] }
   0x5   :  { %551 = vmatpush3.bf16.msra.mxu0 %v550_v7  ;;  %v556_v14 = vpack.c.bf16 %v62_v12, %v61_v11  ;;  %v46_v16 = vld [vmem:[%s854_s1 + $0x28] sm:$0xff]  ;;  %v64_v18 = vld [vmem:[%s854_s1 + $0xb8] sm:$0xff]  ;;  %v47_v21 = vld [vmem:[%s854_s1 + $0x30] sm:$0xff] }
   0x6   :  { %553 = vmatprep.subr.bf16.mxu0 %v552_v8  ;;  %v558_v19 = vpack.c.bf16 %v46_v16, %v45_v15  ;;  %v560_v20 = vpack.c.bf16 %v64_v18, %v63_v17  ;;  %v48_v22 = vld [vmem:[%s854_s1 + $0x38] sm:$0xff]  ;;  %v65_v23 = vld [vmem:[%s854_s1 + $0xc0] sm:$0xff]  ;;  %v66_v24 = vld [vmem:[%s854_s1 + $0xc8] sm:$0xff] }
   0x7   :  { %v487_v25 = vld.sshfl [vmem:[%s853_s0] sm:$0x33 pattern:$0x76325410] }
   0x8   :  { %v88_v26 = vcombine.high %v487_v25, %v487_v25 }
   0x9   :  { %555 = vmatpush3.bf16.msra.mxu0 %v554_v13 }
   0xa   :  { %557 = vmatprep.subr.bf16.mxu0 %v556_v14 }
   0xb   :  { %19 = vsyncpa [#allocation5], 0  ;;  %v562_v27 = vpack.c.bf16 %v48_v22, %v47_v21  ;;  %v564_v28 = vpack.c.bf16 %v66_v24, %v65_v23  ;;  %v49_v29 = vld [vmem:[%s854_s1 + $0x40] sm:$0xff]  ;;  %v50_v30 = vld [vmem:[%s854_s1 + $0x48] sm:$0xff]  ;;  %155 = vmatprep.mubr.f32.mxu0 %v88_v26  ;;  %v634_v50 = vmov 0.0   ;;  %vm174_vm0 = vcmask 1043456  }
   0xc   :  { %v67_v31 = vld [vmem:[%s854_s1 + $0xd0] sm:$0xff]  ;;  %v68_v32 = vld [vmem:[%s854_s1 + $0xd8] sm:$0xff]  ;;  %v566_v33 = vpack.c.bf16 %v50_v30, %v49_v29  ;;  %v69_v37 = vld [vmem:[%s854_s1 + $0xe0] sm:$0xff]  ;;  %538 = vmatprep.subr.mxu1 %v634_v50  ;;  %vm635_vm1 = vmmov 0   ;;  %vm170_vm2 = vcmask 31744   ;;  %vm361_vm3 = vcmask 1041408  }
   0xd   :  { %559 = vmatpush3.bf16.msra.mxu0 %v558_v19  ;;  %v568_v34 = vpack.c.bf16 %v68_v32, %v67_v31  ;;  %v51_v35 = vld [vmem:[%s854_s1 + $0x50] sm:$0xff]  ;;  %v52_v36 = vld [vmem:[%s854_s1 + $0x58] sm:$0xff]  ;;  %v70_v38 = vld [vmem:[%s854_s1 + $0xe8] sm:$0xff]  ;;  %540 = vmatprep.mubr.msk.f32.mxu1 %vm635_vm1, %v634_v50  ;;  %vm451_vm4 = vcmask 9216   ;;  %vm357_vm5 = vcmask 15360  }
   0xe   :  { %561 = vmatprep.subr.bf16.mxu0 %v560_v20  ;;  %v570_v39 = vpack.c.bf16 %v52_v36, %v51_v35  ;;  %v572_v40 = vpack.c.bf16 %v70_v38, %v69_v37  ;;  %v53_v41 = vld [vmem:[%s854_s1 + $0x60] sm:$0xff]  ;;  %v54_v42 = vld [vmem:[%s854_s1 + $0x68] sm:$0xff]  ;;  %v71_v43 = vld [vmem:[%s854_s1 + $0xf0] sm:$0xff] }
   0xf   :  { %v72_v44 = vld [vmem:[%s854_s1 + $0xf8] sm:$0xff]  ;;  %v574_v45 = vpack.c.bf16 %v54_v42, %v53_v41  ;;  %v55_v47 = vld [vmem:[%s854_s1 + $0x70] sm:$0xff]  ;;  %v162_v51 = vld [vmem:[%s856_s3] sm:$0xf] }
  0x10   :  { %v576_v46 = vpack.c.bf16 %v72_v44, %v71_v43  ;;  %v56_v48 = vld [vmem:[%s854_s1 + $0x78] sm:$0xff]  ;;  %539 = vmatpush3.msk.msra.mxu1 %vm174_vm0, %v162_v51  ;;  %v486_v53 = vld [vmem:[%s855_s2] ss:$0 sm:$0xff] }
  0x11   :  { %563 = vmatpush3.bf16.msra.mxu0 %v562_v27  ;;  %v578_v49 = vpack.c.bf16 %v56_v48, %v55_v47  ;;  %543 = vmatprep.subr.mxu1 %v634_v50  ;;  %v248_v58 = vld [vmem:[%s858_s5] sm:$0xf] }
  0x12   :  { %565 = vmatprep.subr.bf16.mxu0 %v564_v28  ;;  %v494_v59 = vld.sshfl [vmem:[%s861_s8] sm:$0x33 pattern:$0x76325410] }
  0x13   :  { %v356_v60 = vcombine.high %v494_v59, %v494_v59  ;;  %v488_v61 = vld [vmem:[%s857_s4] ss:$0 sm:$0xff]  ;;  %s636_s4 = smov [#allocation2]  }
  0x14   :  { %v491_v1 = vld [vmem:[%s859_s6] ss:$0 sm:$0xff]  ;;  %s462_s22 = sshll.u32 %s636_s4, 4  ;;  %s637_s6 = smov [#allocation4]   ;;  %s463_s22 = int_to_ptr.vmem [resolvable:$true] %s462_s22 }
  0x15   :  { %567 = vmatpush3.bf16.msra.mxu0 %v566_v33  ;;  %v329_v7 = vld [vmem:[%s860_s7] sm:$0x3]  ;;  %s472_s23 = sshll.u32 %s637_s6, 4  ;;  %s586_s24 = scalar_lea.vmem %s463_s22, 32  ;;  %s473_s23 = int_to_ptr.vmem [resolvable:$true] %s472_s23 }
  0x16   :  { %569 = vmatprep.subr.bf16.mxu0 %v568_v34  ;;  %p587_p0 = scmp.ne.s32.totalorder %s463_s22, %s586_s24  ;;  %p591_p1 = scmp.lt.s32.totalorder %s463_s22, %s463_s22 }
  0x17   :  { %p592_p2 = scmp.lt.s32.totalorder %s586_s24, %s586_s24 }
  0x19   :  { %571 = vmatpush3.bf16.msra.mxu0 %v570_v39  ;;  %p593_p3 = por %p592_p2, %p591_p1 }
  0x1a   :  { %573 = vmatprep.subr.bf16.mxu0 %v572_v40 }
  0x1b   :  { %p594_p4 = pnand %p593_p3, %p587_p0 }
  0x1d   :  { %575 = vmatpush3.bf16.msra.mxu0 %v574_v45 }
  0x1e   :  { %577 = vmatprep.subr.bf16.mxu0 %v576_v46 }
  0x21   :  { %579 = vmatpush3.bf16.msra.mxu0 %v578_v49 }
  0x24   :  { %156 = vmatmul.mubr.f32.vlgmr.msra.gmra.mrb[0].mxu0 %v487_v25 }
  0xf7   :  { %v531_v52 = vpop.f32.mrb[0].mxu0 }
  0xf8   :  { %v532_v54 = vpop.f32.mrb[1].mxu0 }
  0xf9   :  { %v533_v55 = vadd.f32 %v532_v54, %v531_v52 }
  0xfb   :  { %v158_v56 = vadd.f32 %v533_v55, %v486_v53 }
  0xfd   :  { %v161_v57 = vmax.f32 %v158_v56, 0.0 }
  0xff   :  { %541 = vmatmul.mubr.msk.f32.vlgmr.msra.gmra.mrb[0].mxu1 %vm170_vm2, %v161_v57 }
 0x100   :  { %544 = vmatpush3.msk.msra.mxu1 %vm174_vm0, %v248_v58  ;;  %545 = vmatprep.mubr.msk.f32.mxu1 %vm635_vm1, %v634_v50 }
 0x101   :  { %495 = vmatprep.subr.msk.mxu1 %vm361_vm3, %v356_v60 }
 0x103   :  { %546 = vmatmul.mubr.msk.f32.vlgmr.msra.gmra.mrb[2].mxu1 %vm170_vm2, %v161_v57 }
 0x104   :  { %430 = vmatprep.mubr.f32.mxu1 %v634_v50  ;;  %496 = vmatpush1.msk.msra.mxu1 %vm361_vm3, %v494_v59 }
 0x1d2   :  { %v244_v62 = vpop.f32.mrb[0].mxu1 }
 0x1d3   :  { %v245_v63 = vadd.f32 %v488_v61, %v244_v62  ;;  %v542_v0 = vpop.f32.mrb[1].mxu1 }
 0x1d5   :  { %452 = vst.msk [vmem:[#allocation2] sm:$0x3] %vm451_vm4, %v245_v63 }
 0x1d6   :  { %v325_v2 = vpop.f32.mrb[2].mxu1 }
 0x1d7   :  { %v326_v3 = vadd.f32 %v491_v1, %v325_v2  ;;  %v547_v4 = vpop.f32.mrb[3].mxu1 }
 0x1d9   :  { %v330_v5 = vmul.f32 0.5, %v326_v3  ;;  %453 = vst.msk [vmem:[#allocation4] sm:$0x3] %vm451_vm4, %v326_v3 }
 0x1db   :  { %v331_v6 = vmul.f32 1.442695, %v330_v5 }
 0x1dd   :  { %584 = vpow2.f32 %v331_v6 }
 0x1e7   :  { %v585_v8 = vpop.eup %584 }
 0x1e8   :  { %v333_v9 = vmul.f32 %v585_v8, %v329_v7 }
 0x1ea   :  { %v334_v10 = vadd.f32 %v333_v9, %v245_v63 }
 0x1ec   :  { %497 = vmatmul.mubr.msk.f32.vlgmr.msra.gmra.mrb[4].mxu1 %vm357_vm5, %v334_v10 }
 0x1ed   :  { %597 = shalt.err (!%p594_p4)
}
 0x1ee   :  { %s598_s26 = scalar_lea.hbm %s864_s11, 32 }
 0x1ef   :  { %p599_p5 = scmp.ne.s32.totalorder %s864_s11, %s598_s26  ;;  %p602_p6 = scmp.lt.u32.totalorder %s598_s26, %s864_s11 }
 0x1f1   :  { %p604_p7 = pnand %p602_p6, %p599_p5 }
 0x1f3   :  { %607 = shalt.err (!%p604_p7)
}
 0x1f4   :  { %465 = dma.vmem_to_hbm [thread:$0]  %s463_s22, 32, %s864_s11, [#allocation3]  }
 0x1f5   :  { %s608_s14 = scalar_lea.vmem %s473_s23, 32  ;;  %p613_p9 = scmp.lt.s32.totalorder %s473_s23, %s473_s23 }
 0x1f6   :  { %p609_p8 = scmp.ne.s32.totalorder %s473_s23, %s608_s14  ;;  %p614_p10 = scmp.lt.s32.totalorder %s608_s14, %s608_s14 }
 0x1f8   :  { %p615_p11 = por %p614_p10, %p613_p9 }
 0x1fa   :  { %p616_p12 = pnand %p615_p11, %p609_p8 }
 0x1fc   :  { %619 = shalt.err (!%p616_p12)
}
 0x1fd   :  { %s620_s1 = scalar_lea.hbm %s865_s12, 32 }
 0x1fe   :  { %p621_p13 = scmp.ne.s32.totalorder %s865_s12, %s620_s1  ;;  %p624_p0 = scmp.lt.u32.totalorder %s620_s1, %s865_s12 }
 0x200   :  { %p626_p1 = pnand %p624_p0, %p621_p13 }
 0x202   :  { %629 = shalt.err (!%p626_p1)
}
 0x203   :  { %475 = dma.vmem_to_hbm [thread:$0]  %s473_s23, 32, %s865_s12, [#allocation5]   ;;  %v338_v11 = vlaneseq  ;;  %v336_v14 = vld [vmem:[%s862_s9] sm:$0x3] }
 0x205   :  { %v339_v12 = vshrl.u32 %v338_v11, 7 }
 0x207   :  { %v340_v13 = vsub.s32 0, %v339_v12  ;;  %v344_v15 = vsub.s32 1, %v339_v12 }
 0x209   :  { %v341_v16 = vrot.slane %v336_v14, %v340_v13  ;;  %v345_v17 = vrot.slane %v336_v14, %v344_v15 }
 0x2bf   :  { %v432_v18 = vpop.f32.mrb[4].mxu1 }
 0x2c0   :  { %v433_v19 = vadd.f32 %v432_v18, %v341_v16  ;;  %v434_v20 = vpop.f32.mrb[5].mxu1 }
 0x2c1   :  { %v435_v21 = vadd.f32 %v434_v20, %v345_v17 }
 0x2c2   :  { %v437_v22 = vmax.f32 %v433_v19, 0.0 }
 0x2c3   :  { %v438_v23 = vmax.f32 %v435_v21, 0.0 }
 0x2c5   :  { %v441_v24 = vcombine.low %v437_v22, %v438_v23 }
 0x2c7   :  { %498 = vst.sshfl [vmem:[%s863_s10] sm:$0x33 pattern:$0x76325410] %v441_v24 }
 0x2c8   :  { %630 = dma.done.wait [#allocation3], 32  }
 0x2c9   :  { %631 = vsyncadd [#allocation3], 4294967264 }
 0x2ca   :  { %632 = dma.done.wait [#allocation5], 32  }
 0x2cb   :  { %633 = vsyncadd [#allocation5], 4294967264 }
 0x2cc   :  { %484 = vsyncpa [#allocation3], 1 }
 0x2cd   :  { %485 = vsyncpa [#allocation5], 1 }

// kernel: vae_forward.5
= control target key start
LH: loop header
LB: loop body
LE: loop exit
PB: predicated region body
PF: predicated region fallthrough
CT: control target
= control target key end

     0   :  { %s1228_s21 = smov 0   ;;  %s1366_s0 = inlined_call_operand.vmem [shape: bf16[2,16,33], index: 0, kind: input, shape index: {}]   ;;  %s1367_s1 = inlined_call_operand.vmem [shape: f32[1,25], index: 1, kind: input, shape index: {}]   ;;  %s1368_s2 = inlined_call_operand.vmem [shape: bf16[32,64], index: 2, kind: input, shape index: {}]   ;;  %s1369_s3 = inlined_call_operand.vmem [shape: f32[32,1], index: 3, kind: input, shape index: {}]   ;;  %s1370_s4 = inlined_call_operand.vmem [shape: bf16[32,32], index: 4, kind: input, shape index: {}]   ;;  %s1371_s5 = inlined_call_operand.vmem [shape: f32[32,1], index: 5, kind: input, shape index: {}]   ;;  %s1372_s6 = inlined_call_operand.vmem [shape: f32[2,16,8,25], index: 6, kind: output, shape index: {}]  }
   0x1 LB: > { %s973_s22 = sadd.s32 4294967295, %s1187_s21   ;;  %p977_p0 = scmp.ge.s32.totalorder %s1187_s21, 1  ;;  %s1187_s21 = sphi %s1228_s21, %s16_s21  }
   0x2   : > { %p212_p1 = scmp.lt.s32.totalorder %s1187_s21, 3 }
   0x4   : > { %p213_p2 = pnand %p977_p0, %p212_p1 }
   0x5   : > { %p242_p3 = scmp.lt.s32.totalorder (!%p213_p2), %s973_s22, 1  ;;  %v1107_v0 = vld [vmem:[%s1368_s2] sm:$0xff] (!%p213_p2)   ;;  %vm308_vm0 = vcmask (!%p213_p2), 523264   ;;  %s1189_s29 = smov (!%p213_p2), 127   ;;  %v1191_v3 = vmov (!%p213_p2), 0   ;;  %v276_v4 = vld [vmem:[%s1369_s3 + $0x10] sm:$0xff] (!%p213_p2) }
   0x6   : > { %216 = sbr.rel (%p213_p2) target bundleno = 748 (0x2ec), region = 44  ;;  %1053 = vmatprep.mubr.msk.bf16.mxu0 (!%p213_p2), %vm308_vm0, %v1107_v0  ;;  %s1190_s30 = smov (!%p213_p2), 122   ;;  %v274_v2 = vld [vmem:[%s1369_s3] sm:$0xff] (!%p213_p2)  ;;  %1104 = vset.pattern.permute.xlu1 (!%p213_p2), %v1191_v3  ;;  %v275_v5 = vld [vmem:[%s1369_s3 + $0x8] sm:$0xff] (!%p213_p2)  ;;  %v277_v6 = vld [vmem:[%s1369_s3 + $0x18] sm:$0xff] (!%p213_p2)  ;;  %vm428_vm1 = vcmask (!%p213_p2), 261120  }
   0x7   : > { %1105 = vset.pattern.permute.xlu0 (!%p213_p2), %v1191_v3  ;;  %s1192_s9 = smov (!%p213_p2), 123   ;;  %v1108_v10 = vld [vmem:[%s1368_s2 + $0x8] sm:$0xff] (!%p213_p2)   ;;  %v1109_v11 = vld [vmem:[%s1370_s4] sm:$0xff] (!%p213_p2)   ;;  %vm381_vm2 = vcmask (!%p213_p2), 203776   ;;  %v396_v43 = vld [vmem:[%s1371_s5 + $0x10] sm:$0xff] (!%p213_p2)  ;;  %vm387_vm3 = vcmask (!%p213_p2), 1043456  }
   0x8   : > { %1061 = vmatprep.mubr.msk.bf16.mxu1 (!%p213_p2), %vm428_vm1, %v1109_v11  ;;  %v987_v24 = vld [vmem:[%s1367_s1] ss:$0 sm:$0xff] (!%p213_p2)  ;;  %v1110_v40 = vld [vmem:[%s1370_s4 + $0x8] sm:$0xff] (!%p213_p2)   ;;  %v397_v45 = vld [vmem:[%s1371_s5 + $0x18] sm:$0xff] (!%p213_p2) }
   0x9   : > { %v1113_v36 = vld [vmem:[%s1370_s4] sm:$0xff] (!%p213_p2)   ;;  %v395_v44 = vld [vmem:[%s1371_s5 + $0x8] sm:$0xff] (!%p213_p2) }
   0xa   : > { %v1111_v41 = vld [vmem:[%s1370_s4] sm:$0xff] (!%p213_p2)   ;;  %v1112_v51 = vld [vmem:[%s1370_s4 + $0x8] sm:$0xff] (!%p213_p2)  }
   0xb   : > { %v394_v42 = vld [vmem:[%s1371_s5] sm:$0xff] (!%p213_p2)  ;;  %v1114_v55 = vld [vmem:[%s1370_s4 + $0x8] sm:$0xff] (!%p213_p2)  }
   0xc   : > { %v1115_v52 = vld [vmem:[%s1370_s4] sm:$0xff] (!%p213_p2)   ;;  %v1116_v57 = vld [vmem:[%s1370_s4 + $0x8] sm:$0xff] (!%p213_p2)  }
   0xd   : > { %s1374_s22 = smov (!%p242_p3, %s973_s22), 1 }
   0xe   : > { %s1021_s23 = sshll.u32 %s1374_s22, 3  ;;  %s1022_s24 = sshll.u32 %s1374_s22, 7 }
   0xf   : > { %s246_s28 = scalar_lea.vmem %s1366_s0, %s1021_s23  ;;  %s1329_s27 = scalar_lea.vmem %s1372_s6, %s1022_s24 }
  0x10   : > { %v1106_v1 = vld [vmem:[%s246_s28] sm:$0xff]  }
  0x11   : > { %261 = vrot.lane.b32.xlu0 %v1106_v1, %s1189_s29  ;;  %267 = vrot.lane.b32.xlu1 %v1106_v1, %s1190_s30 }
  0x12   : > { %1045 = vmatprep.subr.bf16.mxu0 %v1106_v1 }
  0x13   : > { %1046 = vmatpush3.bf16.msra.mxu0 %v1106_v1 }
  0x15   : > { %264 = vrot.lane.b32.xlu0 %v1106_v1, %s1192_s9  ;;  %280 = vperm.xlu1 %1104, %v274_v2  }
  0x19   : > { %290 = vperm.xlu1 %1104, %v276_v4   ;;  %285 = vperm.xlu0 %1105, %v275_v5  }
  0x1d   : > { %295 = vperm.xlu1 %1104, %v277_v6  }
  0x83   : > { %v262_v7 = vpop.permute.xlu0 %261  ;;  %v268_v9 = vpop.permute.xlu1 %267 }
  0x84   : > { %1047 = vmatprep.subr.bf16.mxu0 %v262_v7 }
  0x85   : > { %1048 = vmatpush3.bf16.msra.mxu0 %v262_v7 }
  0x87   : > { %v265_v8 = vpop.permute.xlu0 %264 }
  0x88   : > { %1049 = vmatprep.subr.bf16.mxu0 %v265_v8 }
  0x89   : > { %1050 = vmatpush3.bf16.msra.mxu0 %v265_v8 }
  0x8a   : > { %1051 = vmatprep.subr.bf16.mxu0 %v268_v9 }
  0x8d   : > { %1052 = vmatpush3.bf16.msra.mxu0 %v268_v9 }
  0x90   : > { %1054 = vmatmul.mubr.msk.bf16.vlgmr.msra.gmra.mrb[0].mxu0 %vm308_vm0, %v1108_v10 }
  0x91   : > { %1077 = vmatprep.mubr.msk.bf16.mxu0 %vm428_vm1, %v1113_v36 }
  0x94   : > { %v281_v12 = vpop.permute.xlu1 %280 }
  0x98   : > { %v291_v13 = vpop.permute.xlu1 %290  ;;  %v286_v17 = vpop.permute.xlu0 %285 }
  0x9c   : > { %v296_v18 = vpop.permute.xlu1 %295 }
 0x163   : > { %v1055_v14 = vpop.f32.mrb[0].mxu0 }
 0x164   : > { %v358_v15 = vadd.f32 %v1055_v14, %v291_v13  ;;  %v349_v16 = vpop.f32.mrb[1].mxu0 }
 0x165   : > { %v350_v19 = vadd.f32 %v349_v16, %v281_v12  ;;  %v1056_v20 = vpop.f32.mrb[2].mxu0 }
 0x166   : > { %v366_v21 = vmax.f32 %v358_v15, 0.0  ;;  %v361_v22 = vadd.f32 %v1056_v20, %v296_v18  ;;  %v352_v23 = vpop.f32.mrb[3].mxu0 }
 0x167   : > { %v364_v25 = vmax.f32 %v350_v19, 0.0  ;;  %v353_v26 = vadd.f32 %v352_v23, %v286_v17 }
 0x168   : > { %v367_v27 = vmax.f32 %v361_v22, 0.0  ;;  %v377_v29 = vmul.f32 %v987_v24, %v366_v21 }
 0x169   : > { %v365_v28 = vmax.f32 %v353_v26, 0.0  ;;  %v375_v31 = vmul.f32 %v987_v24, %v364_v25 }
 0x16a   : > { %v378_v30 = vmul.f32 %v987_v24, %v367_v27 }
 0x16b   : > { %v376_v32 = vmul.f32 %v987_v24, %v365_v28 }
 0x16c   : > { %v380_v33 = vpack.c.bf16 %v378_v30, %v377_v29 }
 0x16d   : > { %v379_v34 = vpack.c.bf16 %v376_v32, %v375_v31 }
 0x16e   : > { %1091 = vmatprep.subr.msk.bf16.mxu0 %vm381_vm2, %v380_v33  ;;  %v386_v35 = vsel %vm381_vm2, %v380_v33, 0 }
 0x16f   : > { %1089 = vmatprep.subr.msk.bf16.mxu1 %vm381_vm2, %v379_v34  ;;  %1074 = vmatpush3.bf16.msra.mxu0 %v386_v35  ;;  %v384_v37 = vsel %vm381_vm2, %v379_v34, 0  ;;  %v520_v38 = vrot.slane %v386_v35, 4 }
 0x170   : > { %1058 = vmatpush3.bf16.msra.mxu1 %v384_v37  ;;  %v516_v39 = vrot.slane %v384_v37, 4 }
 0x171   : > { %521 = vrot.lane.b32.xlu1 %v520_v38, %s1189_s29  ;;  %1090 = vmatprep.subr.msk.bf16.mxu1 %vm381_vm2, %v380_v33 }
 0x172   : > { %517 = vrot.lane.b32.xlu0 %v516_v39, %s1189_s29 }
 0x174   : > { %1060 = vmatpush3.bf16.msra.mxu1 %v386_v35 }
 0x175   : > { %787 = vrot.lane.b32.xlu1 %v516_v39, %s1190_s30 }
 0x176   : > { %785 = vrot.lane.b32.xlu0 %v516_v39, %s1192_s9 }
 0x177   : > { %1062 = vmatmul.mubr.msk.bf16.vlgmr.msra.gmra.mrb[0].mxu1 %vm428_vm1, %v1110_v40 }
 0x178   : > { %1069 = vmatprep.mubr.msk.bf16.mxu1 %vm428_vm1, %v1111_v41 }
 0x179   : > { %400 = vperm.xlu1 %1104, %v394_v42  }
 0x17a   : > { %656 = vrot.lane.b32.xlu0 %v384_v37, %s1192_s9 }
 0x17d   : > { %410 = vperm.xlu1 %1104, %v396_v43  }
 0x17e   : > { %405 = vperm.xlu0 %1105, %v395_v44  }
 0x181   : > { %541 = vperm.xlu1 %1104, %v394_v42  }
 0x182   : > { %415 = vperm.xlu0 %1105, %v397_v45  }
 0x185   : > { %551 = vperm.xlu1 %1104, %v396_v43  }
 0x186   : > { %546 = vperm.xlu0 %1105, %v395_v44  }
 0x189   : > { %670 = vperm.xlu1 %1104, %v394_v42  }
 0x18a   : > { %556 = vperm.xlu0 %1105, %v397_v45  }
 0x18d   : > { %680 = vperm.xlu1 %1104, %v396_v43  }
 0x18e   : > { %675 = vperm.xlu0 %1105, %v395_v44  }
 0x191   : > { %803 = vperm.xlu1 %1104, %v394_v42  }
 0x192   : > { %685 = vperm.xlu0 %1105, %v397_v45  }
 0x195   : > { %813 = vperm.xlu1 %1104, %v396_v43  }
 0x196   : > { %808 = vperm.xlu0 %1105, %v395_v44  }
 0x19a   : > { %818 = vperm.xlu0 %1105, %v397_v45  }
 0x1e3   : > { %v522_v46 = vpop.permute.xlu1 %521 }
 0x1e4   : > { %v518_v47 = vpop.permute.xlu0 %517  ;;  %v529_v49 = vsel %vm387_vm3, %v520_v38, %v522_v46 }
 0x1e5   : > { %v525_v48 = vsel %vm387_vm3, %v516_v39, %v518_v47 }
 0x1e6   : > { %1065 = vmatprep.subr.bf16.mxu1 %v525_v48 }
 0x1e7   : > { %1066 = vmatpush3.bf16.msra.mxu1 %v525_v48  ;;  %v788_v53 = vpop.permute.xlu1 %787 }
 0x1e8   : > { %v786_v50 = vpop.permute.xlu0 %785  ;;  %1067 = vmatprep.subr.bf16.mxu1 %v529_v49 }
 0x1e9   : > { %v791_v56 = vsel %vm387_vm3, %v786_v50, %v788_v53 }
 0x1eb   : > { %1068 = vmatpush3.bf16.msra.mxu1 %v529_v49 }
 0x1ec   : > { %v657_v54 = vpop.permute.xlu0 %656  ;;  %1081 = vmatprep.subr.bf16.mxu1 %v529_v49 }
 0x1ed   : > { %1075 = vmatprep.subr.bf16.mxu0 %v657_v54 }
 0x1ee   : > { %1070 = vmatmul.mubr.msk.bf16.vlgmr.msra.gmra.mrb[4].mxu1 %vm428_vm1, %v1112_v51  ;;  %1076 = vmatpush3.bf16.msra.mxu0 %v657_v54 }
 0x1ef   : > { %1082 = vmatpush3.bf16.msra.mxu1 %v529_v49  ;;  %1085 = vmatprep.mubr.msk.bf16.mxu1 %vm428_vm1, %v1115_v52 }
 0x1f0   : > { %1083 = vmatprep.subr.bf16.mxu1 %v791_v56 }
 0x1f1   : > { %1078 = vmatmul.mubr.msk.bf16.vlgmr.msra.gmra.mrb[4].mxu0 %vm428_vm1, %v1114_v55 }
 0x1f3   : > { %1084 = vmatpush3.bf16.msra.mxu1 %v791_v56 }
 0x1f6   : > { %1086 = vmatmul.mubr.msk.bf16.vlgmr.msra.gmra.mrb[8].mxu1 %vm428_vm1, %v1116_v57 }
 0x1f8   : > { %v401_v58 = vpop.permute.xlu1 %400 }
 0x1fc   : > { %v411_v60 = vpop.permute.xlu1 %410 }
 0x1fd   : > { %v406_v59 = vpop.permute.xlu0 %405 }
 0x200   : > { %v542_v26 = vpop.permute.xlu1 %541 }
 0x201   : > { %v416_v0 = vpop.permute.xlu0 %415 }
 0x204   : > { %v552_v28 = vpop.permute.xlu1 %551 }
 0x205   : > { %v547_v27 = vpop.permute.xlu0 %546 }
 0x208   : > { %v671_v30 = vpop.permute.xlu1 %670 }
 0x209   : > { %v557_v29 = vpop.permute.xlu0 %556 }
 0x20c   : > { %v681_v32 = vpop.permute.xlu1 %680 }
 0x20d   : > { %v676_v31 = vpop.permute.xlu0 %675 }
 0x210   : > { %v804_v37 = vpop.permute.xlu1 %803 }
 0x211   : > { %v686_v33 = vpop.permute.xlu0 %685 }
 0x215   : > { %v809_v44 = vpop.permute.xlu0 %808 }
 0x24a   : > { %v1063_v61 = vpop.f32.mrb[0].mxu1 }
 0x24b   : > { %v478_v62 = vadd.f32 %v1063_v61, %v411_v60  ;;  %v469_v63 = vpop.f32.mrb[1].mxu1  ;;  %v814_v61 = vpop.permute.xlu1 %813 }
 0x24c   : > { %v470_v1 = vadd.f32 %v469_v63, %v401_v58  ;;  %v1064_v2 = vpop.f32.mrb[2].mxu1 }
 0x24d   : > { %v486_v3 = vsub.f32 0.0, %v478_v62  ;;  %v481_v4 = vadd.f32 %v1064_v2, %v416_v0  ;;  %v472_v5 = vpop.f32.mrb[3].mxu1 }
 0x24e   : > { %v484_v6 = vsub.f32 0.0, %v470_v1  ;;  %v473_v7 = vadd.f32 %v472_v5, %v406_v59 }
 0x24f   : > { %v492_v8 = vmul.f32 1.442695, %v486_v3  ;;  %v487_v9 = vsub.f32 0.0, %v481_v4 }
 0x250   : > { %v488_v10 = vmul.f32 1.442695, %v484_v6  ;;  %v485_v11 = vsub.f32 0.0, %v473_v7  ;;  %v819_v6 = vpop.permute.xlu0 %818 }
 0x251   : > { %1117 = vpow2.f32 %v492_v8  ;;  %v494_v12 = vmul.f32 1.442695, %v487_v9 }
 0x252   : > { %1119 = vpow2.f32 %v488_v10  ;;  %v490_v13 = vmul.f32 1.442695, %v485_v11 }
 0x253   : > { %1121 = vpow2.f32 %v494_v12 }
 0x254   : > { %1123 = vpow2.f32 %v490_v13 }
 0x25b   : > { %v1118_v14 = vpop.eup %1117 }
 0x25c   : > { %v1120_v15 = vpop.eup %1119  ;;  %v498_v16 = vadd.f32 1.0, %v1118_v14 }
 0x25d   : > { %v1122_v17 = vpop.eup %1121  ;;  %v496_v18 = vadd.f32 1.0, %v1120_v15 }
 0x25e   : > { %v1124_v19 = vpop.eup %1123  ;;  %1125 = vrcp.f32 %v498_v16  ;;  %v499_v20 = vadd.f32 1.0, %v1122_v17 }
 0x25f   : > { %1127 = vrcp.f32 %v496_v18  ;;  %v497_v21 = vadd.f32 1.0, %v1124_v19 }
 0x260   : > { %1129 = vrcp.f32 %v499_v20 }
 0x261   : > { %1131 = vrcp.f32 %v497_v21 }
 0x268   : > { %v1126_v22 = vpop.eup %1125 }
 0x269   : > { %v1128_v23 = vpop.eup %1127  ;;  %993 = vst.msk [vmem:[%s1329_s27 + $0x20] sm:$0xff] %vm381_vm2, %v1126_v22 }
 0x26a   : > { %v1130_v24 = vpop.eup %1129  ;;  %508 = vst.msk [vmem:[%s1329_s27] sm:$0xff] %vm381_vm2, %v1128_v23 }
 0x26b   : > { %v1132_v25 = vpop.eup %1131  ;;  %994 = vst.msk [vmem:[%s1329_s27 + $0x28] sm:$0xff] %vm381_vm2, %v1130_v24 }
 0x26c   : > { %992 = vst.msk [vmem:[%s1329_s27 + $0x8] sm:$0xff] %vm381_vm2, %v1132_v25 }
 0x2c1   : > { %v1071_v34 = vpop.f32.mrb[4].mxu1 }
 0x2c2   : > { %v618_v35 = vadd.f32 %v1071_v34, %v552_v28  ;;  %v609_v36 = vpop.f32.mrb[5].mxu1 }
 0x2c3   : > { %v610_v38 = vadd.f32 %v609_v36, %v542_v26  ;;  %v1072_v39 = vpop.f32.mrb[6].mxu1 }
 0x2c4   : > { %v626_v40 = vsub.f32 0.0, %v618_v35  ;;  %v621_v41 = vadd.f32 %v1072_v39, %v557_v29  ;;  %v612_v42 = vpop.f32.mrb[7].mxu1  ;;  %v1079_v43 = vpop.f32.mrb[4].mxu0 }
 0x2c5   : > { %v624_v45 = vsub.f32 0.0, %v610_v38  ;;  %v613_v46 = vadd.f32 %v612_v42, %v547_v27  ;;  %v747_v47 = vadd.f32 %v1079_v43, %v681_v32  ;;  %v738_v48 = vpop.f32.mrb[5].mxu0 }
 0x2c6   : > { %v632_v49 = vmul.f32 1.442695, %v626_v40  ;;  %v627_v50 = vsub.f32 0.0, %v621_v41  ;;  %v739_v51 = vadd.f32 %v738_v48, %v671_v30  ;;  %v1080_v52 = vpop.f32.mrb[6].mxu0 }
 0x2c7   : > { %v628_v53 = vmul.f32 1.442695, %v624_v45  ;;  %v625_v54 = vsub.f32 0.0, %v613_v46  ;;  %v755_v55 = vsub.f32 0.0, %v747_v47  ;;  %v750_v56 = vadd.f32 %v1080_v52, %v686_v33  ;;  %v741_v57 = vpop.f32.mrb[7].mxu0 }
 0x2c8   : > { %1133 = vpow2.f32 %v632_v49  ;;  %v634_v58 = vmul.f32 1.442695, %v627_v50  ;;  %v753_v59 = vsub.f32 0.0, %v739_v51  ;;  %v742_v60 = vadd.f32 %v741_v57, %v676_v31 }
 0x2c9   : > { %1135 = vpow2.f32 %v628_v53  ;;  %v630_v62 = vmul.f32 1.442695, %v625_v54  ;;  %v761_v63 = vmul.f32 1.442695, %v755_v55  ;;  %v756_v0 = vsub.f32 0.0, %v750_v56  ;;  %v1087_v1 = vpop.f32.mrb[8].mxu1 }
 0x2ca   : > { %1137 = vpow2.f32 %v634_v58  ;;  %v757_v2 = vmul.f32 1.442695, %v753_v59  ;;  %v754_v3 = vsub.f32 0.0, %v742_v60  ;;  %v880_v4 = vadd.f32 %v1087_v1, %v814_v61  ;;  %v871_v5 = vpop.f32.mrb[9].mxu1 }
 0x2cb   : > { %1139 = vpow2.f32 %v630_v62  ;;  %v763_v7 = vmul.f32 1.442695, %v756_v0  ;;  %v872_v8 = vadd.f32 %v871_v5, %v804_v37  ;;  %v1088_v9 = vpop.f32.mrb[10].mxu1 }
 0x2cc   : > { %1141 = vpow2.f32 %v761_v63  ;;  %v759_v10 = vmul.f32 1.442695, %v754_v3  ;;  %v888_v11 = vsub.f32 0.0, %v880_v4  ;;  %v883_v12 = vadd.f32 %v1088_v9, %v819_v6  ;;  %v874_v13 = vpop.f32.mrb[11].mxu1 }
 0x2cd   : > { %1143 = vpow2.f32 %v757_v2  ;;  %v886_v14 = vsub.f32 0.0, %v872_v8  ;;  %v875_v15 = vadd.f32 %v874_v13, %v809_v44 }
 0x2ce   : > { %1145 = vpow2.f32 %v763_v7  ;;  %v894_v16 = vmul.f32 1.442695, %v888_v11  ;;  %v889_v17 = vsub.f32 0.0, %v883_v12 }
 0x2cf   : > { %1147 = vpow2.f32 %v759_v10  ;;  %v890_v18 = vmul.f32 1.442695, %v886_v14  ;;  %v887_v19 = vsub.f32 0.0, %v875_v15 }
 0x2d0   : > { %1149 = vpow2.f32 %v894_v16  ;;  %v896_v20 = vmul.f32 1.442695, %v889_v17 }
 0x2d1   : > { %1151 = vpow2.f32 %v890_v18  ;;  %v892_v21 = vmul.f32 1.442695, %v887_v19 }
 0x2d2   : > { %v1134_v22 = vpop.eup %1133  ;;  %1153 = vpow2.f32 %v896_v20 }
 0x2d3   : > { %v1136_v23 = vpop.eup %1135  ;;  %v638_v24 = vadd.f32 1.0, %v1134_v22  ;;  %1155 = vpow2.f32 %v892_v21 }
 0x2d4   : > { %v1138_v25 = vpop.eup %1137  ;;  %v636_v26 = vadd.f32 1.0, %v1136_v23 }
 0x2d5   : > { %v1140_v27 = vpop.eup %1139  ;;  %1157 = vrcp.f32 %v638_v24  ;;  %v639_v28 = vadd.f32 1.0, %v1138_v25 }
 0x2d6   : > { %v1142_v29 = vpop.eup %1141  ;;  %1159 = vrcp.f32 %v636_v26  ;;  %v637_v30 = vadd.f32 1.0, %v1140_v27 }
 0x2d7   : > { %v1144_v31 = vpop.eup %1143  ;;  %1161 = vrcp.f32 %v639_v28  ;;  %v767_v32 = vadd.f32 1.0, %v1142_v29 }
 0x2d8   : > { %v1146_v33 = vpop.eup %1145  ;;  %1163 = vrcp.f32 %v637_v30  ;;  %v765_v34 = vadd.f32 1.0, %v1144_v31 }
 0x2d9   : > { %v1148_v35 = vpop.eup %1147  ;;  %1165 = vrcp.f32 %v767_v32  ;;  %v768_v36 = vadd.f32 1.0, %v1146_v33 }
 0x2da   : > { %v1150_v37 = vpop.eup %1149  ;;  %1167 = vrcp.f32 %v765_v34  ;;  %v766_v38 = vadd.f32 1.0, %v1148_v35 }
 0x2db   : > { %v1152_v39 = vpop.eup %1151  ;;  %1169 = vrcp.f32 %v768_v36  ;;  %v900_v40 = vadd.f32 1.0, %v1150_v37 }
 0x2dc   : > { %v1154_v41 = vpop.eup %1153  ;;  %1171 = vrcp.f32 %v766_v38  ;;  %v898_v42 = vadd.f32 1.0, %v1152_v39 }
 0x2dd   : > { %v1156_v43 = vpop.eup %1155  ;;  %1173 = vrcp.f32 %v900_v40  ;;  %v901_v44 = vadd.f32 1.0, %v1154_v41 }
 0x2de   : > { %1175 = vrcp.f32 %v898_v42  ;;  %v899_v45 = vadd.f32 1.0, %v1156_v43 }
 0x2df   : > { %v1158_v46 = vpop.eup %1157  ;;  %1177 = vrcp.f32 %v901_v44 }
 0x2e0   : > { %v1160_v47 = vpop.eup %1159  ;;  %1001 = vst.msk [vmem:[%s1329_s27 + $0x30] sm:$0xff] %vm381_vm2, %v1158_v46  ;;  %1179 = vrcp.f32 %v899_v45 }
 0x2e1   : > { %v1162_v48 = vpop.eup %1161  ;;  %999 = vst.msk [vmem:[%s1329_s27 + $0x10] sm:$0xff] %vm381_vm2, %v1160_v47 }
 0x2e2   : > { %v1164_v49 = vpop.eup %1163  ;;  %1002 = vst.msk [vmem:[%s1329_s27 + $0x38] sm:$0xff] %vm381_vm2, %v1162_v48 }
 0x2e3   : > { %v1166_v50 = vpop.eup %1165  ;;  %1000 = vst.msk [vmem:[%s1329_s27 + $0x18] sm:$0xff] %vm381_vm2, %v1164_v49 }
 0x2e4   : > { %v1168_v51 = vpop.eup %1167  ;;  %1009 = vst.msk [vmem:[%s1329_s27 + $0x60] sm:$0xff] %vm381_vm2, %v1166_v50 }
 0x2e5   : > { %v1170_v52 = vpop.eup %1169  ;;  %1007 = vst.msk [vmem:[%s1329_s27 + $0x40] sm:$0xff] %vm381_vm2, %v1168_v51 }
 0x2e6   : > { %v1172_v53 = vpop.eup %1171  ;;  %1010 = vst.msk [vmem:[%s1329_s27 + $0x68] sm:$0xff] %vm381_vm2, %v1170_v52 }
 0x2e7   : > { %v1174_v54 = vpop.eup %1173  ;;  %1008 = vst.msk [vmem:[%s1329_s27 + $0x48] sm:$0xff] %vm381_vm2, %v1172_v53 }
 0x2e8   : > { %v1176_v55 = vpop.eup %1175  ;;  %1017 = vst.msk [vmem:[%s1329_s27 + $0x70] sm:$0xff] %vm381_vm2, %v1174_v54 }
 0x2e9   : > { %v1178_v56 = vpop.eup %1177  ;;  %1015 = vst.msk [vmem:[%s1329_s27 + $0x50] sm:$0xff] %vm381_vm2, %v1176_v55 }
 0x2ea   : > { %v1180_v57 = vpop.eup %1179  ;;  %1018 = vst.msk [vmem:[%s1329_s27 + $0x78] sm:$0xff] %vm381_vm2, %v1178_v56 }
 0x2eb   : > { %1016 = vst.msk [vmem:[%s1329_s27 + $0x58] sm:$0xff] %vm381_vm2, %v1180_v57 }
 0x2ec PF: > { %s16_s21 = sadd.s32 1, %s1187_s21  }
 0x2ed   : > { %p13_p4 = scmp.ge.s32.totalorder %s16_s21, 4  }
 0x2ef   :  { %15 = sbr.rel (!%p13_p4) target bundleno = 1 (0x1), region = 89 }

</bundles_post_ra>
